<compile_context>
chip_gen: v7x
topology: tpu7x:2x2x1
jax: 0.10.0
libtpu: 0.0.40
codegen_flags: <defaults>
</compile_context>

<pallas_src>
import math

import jax
import jax.numpy as jnp
from jax import lax
from jax.experimental import pallas as pl
from jax.experimental.pallas import tpu as pltpu


_LOG_SQRT_2PI = 0.5 * math.log(2.0 * math.pi)
# softplus(_RHO_PAD) == 1  ->  padded elements have sigma=1, log(sigma)=0, w = 0.
_RHO_PAD = math.log(math.e - 1.0)

_ACT_TRANSCENDENTALS = {"relu": 0, "linear": 0, "rbf": 1, "tanh": 1, "sinus": 1,
                        "softplus": 2}


def _round_up(x, m):
    return ((x + m - 1) // m) * m


def _cdiv(a, b):
    return -(-a // b)


def _stable_softplus(x):
    # Numerically stable softplus (avoids exp overflow for large rho).
    return jnp.maximum(x, 0.0) + jnp.log1p(jnp.exp(-jnp.abs(x)))


def _apply_activation(h, activation):
    if activation == "relu":
        return jnp.maximum(h, 0.0)
    if activation == "rbf":
        return jnp.exp(-h * h)
    if activation == "tanh":
        return jnp.tanh(h)
    if activation == "softplus":
        return _stable_softplus(h)
    if activation == "sinus":
        return jnp.sin(h)
    if activation == "linear":
        return h
    raise ValueError(activation)


def _compiler_params(**kwargs):
    cls = getattr(pltpu, "CompilerParams", None) or getattr(pltpu, "TPUCompilerParams")
    return cls(**kwargs)


def _vmem_budget_bytes():
    """Per-core VMEM capacity (generation aware); conservative 64 MiB (v7x) fallback."""
    default = 64 * 1024 * 1024
    get_info = getattr(pltpu, "get_tpu_info", None)
    if get_info is None:
        return default
    try:
        cap = int(get_info().vmem_capacity_bytes)
        return cap if cap > 0 else default
    except Exception:
        return default


def _block_spec(shape, index_map, *, single_buffer=False):
    """BlockSpec; single-buffered when its block index never changes (saves VMEM)."""
    if single_buffer and hasattr(pl, "Buffered"):
        try:
            return pl.BlockSpec(shape, index_map, pipeline_mode=pl.Buffered(1))
        except TypeError:
            pass
    return pl.BlockSpec(shape, index_map)


# ------------------------ kernel A: sampling + KL scalars -------------------------

def _make_sampling_kernel(*, prior_sigma, real_dims):
    dim_in, dim_h, dim_out = real_dims
    log_prior_sigma = math.log(prior_sigma)
    inv_2_prior_var = 1.0 / (2.0 * prior_sigma * prior_sigma)

    # Real (unpadded) element count of all sampled weights + biases.
    n_total = float(dim_h * dim_in + dim_h + dim_out * dim_h + dim_out)
    logq_const = -n_total * _LOG_SQRT_2PI
    logp_const = -n_total * (log_prior_sigma + _LOG_SQRT_2PI)

    def _sample(mu_ref, rho_ref, eps_ref):
        mu = mu_ref[...]
        eps = eps_ref[...]
        sigma = _stable_softplus(rho_ref[...])
        w = mu + sigma * eps
        # (w - mu) == sigma * eps  =>  -(w - mu)^2 / (2 sigma^2) == -0.5 * eps^2
        logq = jnp.sum(-0.5 * (eps * eps) - jnp.log(sigma))
        logp = jnp.sum(-(w * w) * inv_2_prior_var)
        return w, logq, logp

    def kernel(mu1, rho1, mub1, rhob1, mu2, rho2, mub2, rhob2,
               ew1, eb1, ew2, eb2,
               w1_ref, b1_ref, w2_ref, b2_ref, stats_ref):
        w1, q1, p1 = _sample(mu1, rho1, ew1)
        b1, qb1, pb1 = _sample(mub1, rhob1, eb1)
        w2, q2, p2 = _sample(mu2, rho2, ew2)
        b2, qb2, pb2 = _sample(mub2, rhob2, eb2)
        w1_ref[...] = w1.astype(w1_ref.dtype)
        b1_ref[...] = b1
        w2_ref[...] = w2.astype(w2_ref.dtype)
        b2_ref[...] = b2
        stats_ref[0] = q1 + qb1 + q2 + qb2 + logq_const
        stats_ref[1] = p1 + pb1 + p2 + pb2 + logp_const

    return kernel


# --------------------- kernel B: batch-tiled MLP with sampled w -------------------

def _make_mlp_kernel(activation):
    nt = (((1,), (1,)), ((), ()))   # x @ w.T as an NT dot_general (no transpose)

    def kernel(x_ref, w1_ref, b1_ref, w2_ref, b2_ref, y_ref):
        h = lax.dot_general(x_ref[...], w1_ref[...], nt,
                            preferred_element_type=jnp.float32) + b1_ref[...]
        h = _apply_activation(h, activation).astype(w2_ref.dtype)
        y = lax.dot_general(h, w2_ref[...], nt,
                            preferred_element_type=jnp.float32) + b2_ref[...]
        y_ref[...] = y.astype(y_ref.dtype)

    return kernel


# ----------------------------------- wrapper --------------------------------------

def bayesian_mlp_forward(x, params, eps, *, prior_sigma=1.0, activation="relu",
                         matmul_dtype=jnp.bfloat16, batch_tile=1024):
    """Single-sample forward of BayesianMLP.

    Returns (y, log_variational_posterior, log_prior); matches the PyTorch module when
    the reparameterization noise `eps` (dict with w1/b1/w2/b2) is supplied explicitly.
    """
    B, I = x.shape
    H = params["mu1"].shape[0]
    O = params["mu2"].shape[0]

    # Lane-dense padding (feature dims -> multiples of 128).
    ip = _round_up(I, 128)
    hp = _round_up(H, 128)
    op = _round_up(O, 128)

    def pad2(a, shape, fill=0.0):
        a = jnp.asarray(a, jnp.float32)
        if a.ndim == 1:
            a = a.reshape(1, -1)
        return jnp.pad(a, ((0, shape[0] - a.shape[0]), (0, shape[1] - a.shape[1])),
                       constant_values=fill)

    # ---------------- kernel A: sample weights + KL scalars (one shot) -------------
    a_defs = (("mu1", (hp, ip), 0.0), ("rho1", (hp, ip), _RHO_PAD),
              ("mub1", (1, hp), 0.0), ("rhob1", (1, hp), _RHO_PAD),
              ("mu2", (op, hp), 0.0), ("rho2", (op, hp), _RHO_PAD),
              ("mub2", (1, op), 0.0), ("rhob2", (1, op), _RHO_PAD))
    e_defs = (("w1", (hp, ip)), ("b1", (1, hp)), ("w2", (op, hp)), ("b2", (1, op)))
    a_inputs = [pad2(params[name], shape, fill) for name, shape, fill in a_defs]
    a_inputs += [pad2(eps[name], shape, 0.0) for name, shape in e_defs]
    a_shapes = [shape for _, shape, _ in a_defs] + [shape for _, shape in e_defs]

    a_in_specs = [pl.BlockSpec(shape, lambda i: (0, 0)) for shape in a_shapes]
    a_out_shape = (jax.ShapeDtypeStruct((hp, ip), matmul_dtype),
                   jax.ShapeDtypeStruct((1, hp), jnp.float32),
                   jax.ShapeDtypeStruct((op, hp), matmul_dtype),
                   jax.ShapeDtypeStruct((1, op), jnp.float32),
                   jax.ShapeDtypeStruct((2,), jnp.float32))
    a_out_specs = (pl.BlockSpec((hp, ip), lambda i: (0, 0)),
                   pl.BlockSpec((1, hp), lambda i: (0, 0)),
                   pl.BlockSpec((op, hp), lambda i: (0, 0)),
                   pl.BlockSpec((1, op), lambda i: (0, 0)),
                   pl.BlockSpec(memory_space=pltpu.MemorySpace.SMEM))   # scalar logq/logp

    dsize = jnp.dtype(matmul_dtype).itemsize
    n_pad_w = hp * ip + op * hp
    n_pad_b = hp + op
    budget = _vmem_budget_bytes()
    a_bytes = 4 * 3 * (n_pad_w + n_pad_b) + dsize * n_pad_w + 4 * n_pad_b
    a_vmem_limit = int(min(budget, max(2 * a_bytes + (8 << 20), 32 << 20)))

    a_kwargs = dict(compiler_params=_compiler_params(
        dimension_semantics=("arbitrary",), vmem_limit_bytes=a_vmem_limit))
    if hasattr(pl, "CostEstimate"):
        a_kwargs["cost_estimate"] = pl.CostEstimate(
            flops=int(6 * (n_pad_w + n_pad_b)),
            transcendentals=int(3 * (n_pad_w + n_pad_b)),
            bytes_accessed=int(a_bytes))

    w1, b1, w2, b2, stats = pl.pallas_call(
        _make_sampling_kernel(prior_sigma=prior_sigma, real_dims=(I, H, O)),
        out_shape=a_out_shape,
        grid_spec=pltpu.PrefetchScalarGridSpec(
            num_scalar_prefetch=0, grid=(1,),
            in_specs=a_in_specs, out_specs=a_out_specs),
        **a_kwargs,
    )(*a_inputs)

    # ------------- kernel B: batch-tiled matmuls, sampled weights resident ---------
    resident = n_pad_w * dsize + n_pad_b * 4              # one buffer of sampled params
    per_row = 2 * (ip * dsize + op * 4)                   # double-buffered x + y, per row
    avail = int(0.9 * budget) - 2 * resident              # worst case: params double-buffered
    tb_cap = avail // per_row if avail > 0 else 8
    tb_cap = max(8, min(batch_tile, (tb_cap // 8) * 8 if tb_cap >= 8 else 8))

    bp0 = _round_up(B, 8)
    nb = _cdiv(bp0, min(tb_cap, bp0))       # choose nb first so padded batch divides evenly
    tb = _round_up(_cdiv(bp0, nb), 8)
    bp = nb * tb

    xp = pad2(x, (bp, ip)).astype(matmul_dtype)           # matmul-dtype x: half the DMA bytes

    b_vmem_limit = int(min(budget, max(2 * resident + tb * per_row + (8 << 20), 32 << 20)))
    b_kwargs = dict(compiler_params=_compiler_params(
        dimension_semantics=("parallel",),                # no carried state -> megacore OK
        vmem_limit_bytes=b_vmem_limit))
    if hasattr(pl, "CostEstimate"):
        b_kwargs["cost_estimate"] = pl.CostEstimate(
            flops=int(2 * bp * (ip * hp + hp * op)),
            transcendentals=int(_ACT_TRANSCENDENTALS.get(activation, 1) * bp * hp),
            bytes_accessed=int(xp.size * dsize + resident + bp * op * 4))

    def _run_mlp(single_buffer):
        in_specs = [
            pl.BlockSpec((tb, ip), lambda i: (i, 0)),                                  # streamed x
            _block_spec((hp, ip), lambda i: (0, 0), single_buffer=single_buffer),      # resident w1
            _block_spec((1, hp), lambda i: (0, 0), single_buffer=single_buffer),       # resident b1
            _block_spec((op, hp), lambda i: (0, 0), single_buffer=single_buffer),      # resident w2
            _block_spec((1, op), lambda i: (0, 0), single_buffer=single_buffer),       # resident b2
        ]
        yp = pl.pallas_call(
            _make_mlp_kernel(activation),
            out_shape=jax.ShapeDtypeStruct((bp, op), jnp.float32),
            grid_spec=pltpu.PrefetchScalarGridSpec(
                num_scalar_prefetch=0, grid=(nb,),
                in_specs=in_specs,
                out_specs=pl.BlockSpec((tb, op), lambda i: (i, 0))),
            **b_kwargs,
        )(xp, w1, b1, w2, b2)
        return jax.block_until_ready(yp)

    try:
        yp = _run_mlp(True)
    except Exception:   # pipeline_mode=pl.Buffered(1) unsupported -> default double-buffering
        yp = _run_mlp(False)

    return yp[:B, :O], stats[0], stats[1]


# ------------------------------ pure-JAX reference -------------------------------

def _reference_forward(x, params, eps, prior_sigma, activation, matmul_dtype=jnp.float32):
    """Mirror of the PyTorch module: BayesianLinear -> activation -> BayesianLinear."""
    nt = (((1,), (1,)), ((), ()))

    def layer(xx, mu, rho, mub, rhob, ew, eb):
        sw = jax.nn.softplus(rho)
        sb = jax.nn.softplus(rhob)
        w = mu + sw * ew
        b = mub + sb * eb

        def normal_logprob(v, m, s):
            return jnp.sum(-(v - m) ** 2 / (2.0 * s ** 2) - jnp.log(s) - _LOG_SQRT_2PI)

        ps = jnp.float32(prior_sigma)
        logq = normal_logprob(w, mu, sw) + normal_logprob(b, mub, sb)
        logp = normal_logprob(w, 0.0, ps) + normal_logprob(b, 0.0, ps)
        out = lax.dot_general(xx.astype(matmul_dtype), w.astype(matmul_dtype), nt,
                              preferred_element_type=jnp.float32) + b
        return out, logq, logp

    h, q1, p1 = layer(x, params["mu1"], params["rho1"], params["mub1"], params["rhob1"],
                      eps["w1"], eps["b1"])
    h = _apply_activation(h, activation)
    y, q2, p2 = layer(h, params["mu2"], params["rho2"], params["mub2"], params["rhob2"],
                      eps["w2"], eps["b2"])
    return y, q1 + q2, p1 + p2


# ------------------------------------ demo ----------------------------------------

if __name__ == "__main__":
    batch, dim_in, dim_h, dim_out = 8, 16, 32, 8
    prior_sigma = 1.0
    rho_init = -math.log(math.e - 1.0)   # matches torch init -np.log(np.exp(1)-1)

    key = jax.random.PRNGKey(0)
    keys = jax.random.split(key, 13)
    params = {
        "mu1": 0.3 * jax.random.normal(keys[0], (dim_h, dim_in), jnp.float32),
        "rho1": rho_init + 0.2 * jax.random.normal(keys[1], (dim_h, dim_in), jnp.float32),
        "mub1": 0.3 * jax.random.normal(keys[2], (dim_h,), jnp.float32),
        "rhob1": rho_init + 0.2 * jax.random.normal(keys[3], (dim_h,), jnp.float32),
        "mu2": 0.3 * jax.random.normal(keys[4], (dim_out, dim_h), jnp.float32),
        "rho2": rho_init + 0.2 * jax.random.normal(keys[5], (dim_out, dim_h), jnp.float32),
        "mub2": 0.3 * jax.random.normal(keys[6], (dim_out,), jnp.float32),
        "rhob2": rho_init + 0.2 * jax.random.normal(keys[7], (dim_out,), jnp.float32),
    }
    x = jax.random.normal(keys[8], (batch, dim_in), jnp.float32)
    eps = {   # reparameterization noise (rsample = mu + softplus(rho) * eps)
        "w1": jax.random.normal(keys[9], (dim_h, dim_in), jnp.float32),
        "b1": jax.random.normal(keys[10], (dim_h,), jnp.float32),
        "w2": jax.random.normal(keys[11], (dim_out, dim_h), jnp.float32),
        "b2": jax.random.normal(keys[12], (dim_out,), jnp.float32),
    }

    # 1) f32 matmul path: exact check against the pure-JAX reference.
    y, logq, logp = bayesian_mlp_forward(
        x, params, eps, prior_sigma=prior_sigma, activation="relu",
        matmul_dtype=jnp.float32)
    jax.block_until_ready(y)
    y_ref, q_ref, p_ref = _reference_forward(x, params, eps, prior_sigma, "relu")
    assert y.shape == (batch, dim_out)
    assert jnp.allclose(y, y_ref, atol=1e-3, rtol=1e-3), float(jnp.max(jnp.abs(y - y_ref)))
    assert jnp.allclose(logq, q_ref, atol=5e-2, rtol=1e-3), (float(logq), float(q_ref))
    assert jnp.allclose(logp, p_ref, atol=5e-2, rtol=1e-3), (float(logp), float(p_ref))

    # 2) transcendental activation path (rbf), still f32-exact.
    y2, _, _ = bayesian_mlp_forward(
        x, params, eps, prior_sigma=prior_sigma, activation="rbf",
        matmul_dtype=jnp.float32)
    jax.block_until_ready(y2)
    y2_ref, _, _ = _reference_forward(x, params, eps, prior_sigma, "rbf")
    assert jnp.allclose(y2, y2_ref, atol=1e-3, rtol=1e-3)

    # 3) bf16 MXU fast path (KL terms stay f32; only the dot operands are bf16).
    y16, logq16, logp16 = bayesian_mlp_forward(
        x, params, eps, prior_sigma=prior_sigma, activation="relu",
        matmul_dtype=jnp.bfloat16)
    jax.block_until_ready(y16)
    y_ref16, _, _ = _reference_forward(x, params, eps, prior_sigma, "relu",
                                       matmul_dtype=jnp.bfloat16)
    assert jnp.allclose(y16, y_ref16, atol=5e-2, rtol=5e-2)
    assert jnp.allclose(logq16, q_ref, atol=5e-2, rtol=1e-3)
    assert jnp.allclose(logp16, p_ref, atol=5e-2, rtol=1e-3)

    print("KERNEL_OK")
</pallas_src>

<mosaic_0001>
module attributes {stable_mosaic.version = 11 : i64} {
  func.func @kernel(%arg0: i32, %arg1: memref<128x128xf32, #tpu.memory_space<vmem>>, %arg2: memref<128x128xf32, #tpu.memory_space<vmem>>, %arg3: memref<1x128xf32, #tpu.memory_space<vmem>>, %arg4: memref<1x128xf32, #tpu.memory_space<vmem>>, %arg5: memref<128x128xf32, #tpu.memory_space<vmem>>, %arg6: memref<128x128xf32, #tpu.memory_space<vmem>>, %arg7: memref<1x128xf32, #tpu.memory_space<vmem>>, %arg8: memref<1x128xf32, #tpu.memory_space<vmem>>, %arg9: memref<128x128xf32, #tpu.memory_space<vmem>>, %arg10: memref<1x128xf32, #tpu.memory_space<vmem>>, %arg11: memref<128x128xf32, #tpu.memory_space<vmem>>, %arg12: memref<1x128xf32, #tpu.memory_space<vmem>>, %arg13: memref<128x128xf32, #tpu.memory_space<vmem>>, %arg14: memref<1x128xf32, #tpu.memory_space<vmem>>, %arg15: memref<128x128xf32, #tpu.memory_space<vmem>>, %arg16: memref<1x128xf32, #tpu.memory_space<vmem>>, %arg17: memref<2xf32, #tpu.memory_space<smem>>) attributes {dimension_semantics = [#tpu.dimension_semantics<arbitrary>], iteration_bounds = array<i64: 1>, scalar_prefetch = 0 : i64, scratch_operands = 0 : i64, tpu.core_type = #tpu.core_type<tc>, window_params = [{pipeline_mode = #tpu.pipeline_mode<synchronous>, transform_indices = @transform_0, window_bounds = array<i64: 128, 128>}, {pipeline_mode = #tpu.pipeline_mode<synchronous>, transform_indices = @transform_1, window_bounds = array<i64: 128, 128>}, {pipeline_mode = #tpu.pipeline_mode<synchronous>, transform_indices = @transform_2, window_bounds = array<i64: 1, 128>}, {pipeline_mode = #tpu.pipeline_mode<synchronous>, transform_indices = @transform_3, window_bounds = array<i64: 1, 128>}, {pipeline_mode = #tpu.pipeline_mode<synchronous>, transform_indices = @transform_4, window_bounds = array<i64: 128, 128>}, {pipeline_mode = #tpu.pipeline_mode<synchronous>, transform_indices = @transform_5, window_bounds = array<i64: 128, 128>}, {pipeline_mode = #tpu.pipeline_mode<synchronous>, transform_indices = @transform_6, window_bounds = array<i64: 1, 128>}, {pipeline_mode = #tpu.pipeline_mode<synchronous>, transform_indices = @transform_7, window_bounds = array<i64: 1, 128>}, {pipeline_mode = #tpu.pipeline_mode<synchronous>, transform_indices = @transform_8, window_bounds = array<i64: 128, 128>}, {pipeline_mode = #tpu.pipeline_mode<synchronous>, transform_indices = @transform_9, window_bounds = array<i64: 1, 128>}, {pipeline_mode = #tpu.pipeline_mode<synchronous>, transform_indices = @transform_10, window_bounds = array<i64: 128, 128>}, {pipeline_mode = #tpu.pipeline_mode<synchronous>, transform_indices = @transform_11, window_bounds = array<i64: 1, 128>}, {pipeline_mode = #tpu.pipeline_mode<synchronous>, transform_indices = @transform_12, window_bounds = array<i64: 128, 128>}, {pipeline_mode = #tpu.pipeline_mode<synchronous>, transform_indices = @transform_13, window_bounds = array<i64: 1, 128>}, {pipeline_mode = #tpu.pipeline_mode<synchronous>, transform_indices = @transform_14, window_bounds = array<i64: 128, 128>}, {pipeline_mode = #tpu.pipeline_mode<synchronous>, transform_indices = @transform_15, window_bounds = array<i64: 1, 128>}, {transform_indices = @transform_16, window_bounds = array<i64: 2>}]} {
    %c0 = arith.constant 0 : index
    %c0_0 = arith.constant 0 : index
    %0 = vector.load %arg1[%c0, %c0_0] : memref<128x128xf32, #tpu.memory_space<vmem>>, vector<128x128xf32>
    %c0_1 = arith.constant 0 : index
    %c0_2 = arith.constant 0 : index
    %1 = vector.load %arg9[%c0_1, %c0_2] : memref<128x128xf32, #tpu.memory_space<vmem>>, vector<128x128xf32>
    %c0_3 = arith.constant 0 : index
    %c0_4 = arith.constant 0 : index
    %2 = vector.load %arg2[%c0_3, %c0_4] : memref<128x128xf32, #tpu.memory_space<vmem>>, vector<128x128xf32>
    %cst = arith.constant 0.000000e+00 : f32
    %3 = vector.broadcast %cst : f32 to vector<128x128xf32>
    %4 = arith.maximumf %2, %3 : vector<128x128xf32>
    %5 = math.absf %2 : vector<128x128xf32>
    %cst_5 = arith.constant 0.000000e+00 : f32
    %6 = vector.broadcast %cst_5 : f32 to vector<128x128xf32>
    %7 = arith.subf %6, %5 : vector<128x128xf32>
    %8 = math.exp %7 : vector<128x128xf32>
    %9 = math.log1p %8 : vector<128x128xf32>
    %10 = arith.addf %4, %9 : vector<128x128xf32>
    %11 = arith.mulf %10, %1 : vector<128x128xf32>
    %12 = arith.addf %0, %11 : vector<128x128xf32>
    %13 = arith.mulf %1, %1 : vector<128x128xf32>
    %cst_6 = arith.constant -5.000000e-01 : f32
    %14 = vector.broadcast %cst_6 : f32 to vector<128x128xf32>
    %15 = arith.mulf %14, %13 : vector<128x128xf32>
    %16 = math.log %10 : vector<128x128xf32>
    %17 = arith.subf %15, %16 : vector<128x128xf32>
    %18 = vector.shape_cast %17 : vector<128x128xf32> to vector<1x128x128xf32>
    %cst_7 = arith.constant dense<0.000000e+00> : vector<1xf32>
    %19 = vector.multi_reduction <add>, %18, %cst_7 [1, 2] : vector<1x128x128xf32> to vector<1xf32>
    %20 = vector.shape_cast %19 : vector<1xf32> to vector<1x1x1xf32>
    %21 = vector.extract %20[0, 0, 0] : f32 from vector<1x1x1xf32>
    %22 = arith.mulf %12, %12 : vector<128x128xf32>
    %cst_8 = arith.constant 0.000000e+00 : f32
    %23 = vector.broadcast %cst_8 : f32 to vector<128x128xf32>
    %24 = arith.subf %23, %22 : vector<128x128xf32>
    %cst_9 = arith.constant 5.000000e-01 : f32
    %25 = vector.broadcast %cst_9 : f32 to vector<128x128xf32>
    %26 = arith.mulf %24, %25 : vector<128x128xf32>
    %27 = vector.shape_cast %26 : vector<128x128xf32> to vector<1x128x128xf32>
    %cst_10 = arith.constant dense<0.000000e+00> : vector<1xf32>
    %28 = vector.multi_reduction <add>, %27, %cst_10 [1, 2] : vector<1x128x128xf32> to vector<1xf32>
    %29 = vector.shape_cast %28 : vector<1xf32> to vector<1x1x1xf32>
    %30 = vector.extract %29[0, 0, 0] : f32 from vector<1x1x1xf32>
    %c0_11 = arith.constant 0 : index
    %c0_12 = arith.constant 0 : index
    %31 = vector.load %arg3[%c0_11, %c0_12] : memref<1x128xf32, #tpu.memory_space<vmem>>, vector<1x128xf32>
    %c0_13 = arith.constant 0 : index
    %c0_14 = arith.constant 0 : index
    %32 = vector.load %arg10[%c0_13, %c0_14] : memref<1x128xf32, #tpu.memory_space<vmem>>, vector<1x128xf32>
    %c0_15 = arith.constant 0 : index
    %c0_16 = arith.constant 0 : index
    %33 = vector.load %arg4[%c0_15, %c0_16] : memref<1x128xf32, #tpu.memory_space<vmem>>, vector<1x128xf32>
    %cst_17 = arith.constant 0.000000e+00 : f32
    %34 = vector.broadcast %cst_17 : f32 to vector<1x128xf32>
    %35 = arith.maximumf %33, %34 : vector<1x128xf32>
    %36 = math.absf %33 : vector<1x128xf32>
    %cst_18 = arith.constant 0.000000e+00 : f32
    %37 = vector.broadcast %cst_18 : f32 to vector<1x128xf32>
    %38 = arith.subf %37, %36 : vector<1x128xf32>
    %39 = math.exp %38 : vector<1x128xf32>
    %40 = math.log1p %39 : vector<1x128xf32>
    %41 = arith.addf %35, %40 : vector<1x128xf32>
    %42 = arith.mulf %41, %32 : vector<1x128xf32>
    %43 = arith.addf %31, %42 : vector<1x128xf32>
    %44 = arith.mulf %32, %32 : vector<1x128xf32>
    %cst_19 = arith.constant -5.000000e-01 : f32
    %45 = vector.broadcast %cst_19 : f32 to vector<1x128xf32>
    %46 = arith.mulf %45, %44 : vector<1x128xf32>
    %47 = math.log %41 : vector<1x128xf32>
    %48 = arith.subf %46, %47 : vector<1x128xf32>
    %49 = vector.shape_cast %48 : vector<1x128xf32> to vector<1x1x128xf32>
    %cst_20 = arith.constant dense<0.000000e+00> : vector<1xf32>
    %50 = vector.multi_reduction <add>, %49, %cst_20 [1, 2] : vector<1x1x128xf32> to vector<1xf32>
    %51 = vector.shape_cast %50 : vector<1xf32> to vector<1x1x1xf32>
    %52 = vector.extract %51[0, 0, 0] : f32 from vector<1x1x1xf32>
    %53 = arith.mulf %43, %43 : vector<1x128xf32>
    %cst_21 = arith.constant 0.000000e+00 : f32
    %54 = vector.broadcast %cst_21 : f32 to vector<1x128xf32>
    %55 = arith.subf %54, %53 : vector<1x128xf32>
    %cst_22 = arith.constant 5.000000e-01 : f32
    %56 = vector.broadcast %cst_22 : f32 to vector<1x128xf32>
    %57 = arith.mulf %55, %56 : vector<1x128xf32>
    %58 = vector.shape_cast %57 : vector<1x128xf32> to vector<1x1x128xf32>
    %cst_23 = arith.constant dense<0.000000e+00> : vector<1xf32>
    %59 = vector.multi_reduction <add>, %58, %cst_23 [1, 2] : vector<1x1x128xf32> to vector<1xf32>
    %60 = vector.shape_cast %59 : vector<1xf32> to vector<1x1x1xf32>
    %61 = vector.extract %60[0, 0, 0] : f32 from vector<1x1x1xf32>
    %c0_24 = arith.constant 0 : index
    %c0_25 = arith.constant 0 : index
    %62 = vector.load %arg5[%c0_24, %c0_25] : memref<128x128xf32, #tpu.memory_space<vmem>>, vector<128x128xf32>
    %c0_26 = arith.constant 0 : index
    %c0_27 = arith.constant 0 : index
    %63 = vector.load %arg11[%c0_26, %c0_27] : memref<128x128xf32, #tpu.memory_space<vmem>>, vector<128x128xf32>
    %c0_28 = arith.constant 0 : index
    %c0_29 = arith.constant 0 : index
    %64 = vector.load %arg6[%c0_28, %c0_29] : memref<128x128xf32, #tpu.memory_space<vmem>>, vector<128x128xf32>
    %cst_30 = arith.constant 0.000000e+00 : f32
    %65 = vector.broadcast %cst_30 : f32 to vector<128x128xf32>
    %66 = arith.maximumf %64, %65 : vector<128x128xf32>
    %67 = math.absf %64 : vector<128x128xf32>
    %cst_31 = arith.constant 0.000000e+00 : f32
    %68 = vector.broadcast %cst_31 : f32 to vector<128x128xf32>
    %69 = arith.subf %68, %67 : vector<128x128xf32>
    %70 = math.exp %69 : vector<128x128xf32>
    %71 = math.log1p %70 : vector<128x128xf32>
    %72 = arith.addf %66, %71 : vector<128x128xf32>
    %73 = arith.mulf %72, %63 : vector<128x128xf32>
    %74 = arith.addf %62, %73 : vector<128x128xf32>
    %75 = arith.mulf %63, %63 : vector<128x128xf32>
    %cst_32 = arith.constant -5.000000e-01 : f32
    %76 = vector.broadcast %cst_32 : f32 to vector<128x128xf32>
    %77 = arith.mulf %76, %75 : vector<128x128xf32>
    %78 = math.log %72 : vector<128x128xf32>
    %79 = arith.subf %77, %78 : vector<128x128xf32>
    %80 = vector.shape_cast %79 : vector<128x128xf32> to vector<1x128x128xf32>
    %cst_33 = arith.constant dense<0.000000e+00> : vector<1xf32>
    %81 = vector.multi_reduction <add>, %80, %cst_33 [1, 2] : vector<1x128x128xf32> to vector<1xf32>
    %82 = vector.shape_cast %81 : vector<1xf32> to vector<1x1x1xf32>
    %83 = vector.extract %82[0, 0, 0] : f32 from vector<1x1x1xf32>
    %84 = arith.mulf %74, %74 : vector<128x128xf32>
    %cst_34 = arith.constant 0.000000e+00 : f32
    %85 = vector.broadcast %cst_34 : f32 to vector<128x128xf32>
    %86 = arith.subf %85, %84 : vector<128x128xf32>
    %cst_35 = arith.constant 5.000000e-01 : f32
    %87 = vector.broadcast %cst_35 : f32 to vector<128x128xf32>
    %88 = arith.mulf %86, %87 : vector<128x128xf32>
    %89 = vector.shape_cast %88 : vector<128x128xf32> to vector<1x128x128xf32>
    %cst_36 = arith.constant dense<0.000000e+00> : vector<1xf32>
    %90 = vector.multi_reduction <add>, %89, %cst_36 [1, 2] : vector<1x128x128xf32> to vector<1xf32>
    %91 = vector.shape_cast %90 : vector<1xf32> to vector<1x1x1xf32>
    %92 = vector.extract %91[0, 0, 0] : f32 from vector<1x1x1xf32>
    %c0_37 = arith.constant 0 : index
    %c0_38 = arith.constant 0 : index
    %93 = vector.load %arg7[%c0_37, %c0_38] : memref<1x128xf32, #tpu.memory_space<vmem>>, vector<1x128xf32>
    %c0_39 = arith.constant 0 : index
    %c0_40 = arith.constant 0 : index
    %94 = vector.load %arg12[%c0_39, %c0_40] : memref<1x128xf32, #tpu.memory_space<vmem>>, vector<1x128xf32>
    %c0_41 = arith.constant 0 : index
    %c0_42 = arith.constant 0 : index
    %95 = vector.load %arg8[%c0_41, %c0_42] : memref<1x128xf32, #tpu.memory_space<vmem>>, vector<1x128xf32>
    %cst_43 = arith.constant 0.000000e+00 : f32
    %96 = vector.broadcast %cst_43 : f32 to vector<1x128xf32>
    %97 = arith.maximumf %95, %96 : vector<1x128xf32>
    %98 = math.absf %95 : vector<1x128xf32>
    %cst_44 = arith.constant 0.000000e+00 : f32
    %99 = vector.broadcast %cst_44 : f32 to vector<1x128xf32>
    %100 = arith.subf %99, %98 : vector<1x128xf32>
    %101 = math.exp %100 : vector<1x128xf32>
    %102 = math.log1p %101 : vector<1x128xf32>
    %103 = arith.addf %97, %102 : vector<1x128xf32>
    %104 = arith.mulf %103, %94 : vector<1x128xf32>
    %105 = arith.addf %93, %104 : vector<1x128xf32>
    %106 = arith.mulf %94, %94 : vector<1x128xf32>
    %cst_45 = arith.constant -5.000000e-01 : f32
    %107 = vector.broadcast %cst_45 : f32 to vector<1x128xf32>
    %108 = arith.mulf %107, %106 : vector<1x128xf32>
    %109 = math.log %103 : vector<1x128xf32>
    %110 = arith.subf %108, %109 : vector<1x128xf32>
    %111 = vector.shape_cast %110 : vector<1x128xf32> to vector<1x1x128xf32>
    %cst_46 = arith.constant dense<0.000000e+00> : vector<1xf32>
    %112 = vector.multi_reduction <add>, %111, %cst_46 [1, 2] : vector<1x1x128xf32> to vector<1xf32>
    %113 = vector.shape_cast %112 : vector<1xf32> to vector<1x1x1xf32>
    %114 = vector.extract %113[0, 0, 0] : f32 from vector<1x1x1xf32>
    %115 = arith.mulf %105, %105 : vector<1x128xf32>
    %cst_47 = arith.constant 0.000000e+00 : f32
    %116 = vector.broadcast %cst_47 : f32 to vector<1x128xf32>
    %117 = arith.subf %116, %115 : vector<1x128xf32>
    %cst_48 = arith.constant 5.000000e-01 : f32
    %118 = vector.broadcast %cst_48 : f32 to vector<1x128xf32>
    %119 = arith.mulf %117, %118 : vector<1x128xf32>
    %120 = vector.shape_cast %119 : vector<1x128xf32> to vector<1x1x128xf32>
    %cst_49 = arith.constant dense<0.000000e+00> : vector<1xf32>
    %121 = vector.multi_reduction <add>, %120, %cst_49 [1, 2] : vector<1x1x128xf32> to vector<1xf32>
    %122 = vector.shape_cast %121 : vector<1xf32> to vector<1x1x1xf32>
    %123 = vector.extract %122[0, 0, 0] : f32 from vector<1x1x1xf32>
    %c0_50 = arith.constant 0 : index
    %c0_51 = arith.constant 0 : index
    %124 = vector.load %arg13[%c0_50, %c0_51] : memref<128x128xf32, #tpu.memory_space<vmem>>, vector<128x128xf32>
    tpu.vector_store %arg13[%c0_50, %c0_51], %12 {strides = array<i32>} : memref<128x128xf32, #tpu.memory_space<vmem>>, vector<128x128xf32>,
    %c0_52 = arith.constant 0 : index
    %c0_53 = arith.constant 0 : index
    %125 = vector.load %arg14[%c0_52, %c0_53] : memref<1x128xf32, #tpu.memory_space<vmem>>, vector<1x128xf32>
    tpu.vector_store %arg14[%c0_52, %c0_53], %43 {strides = array<i32>} : memref<1x128xf32, #tpu.memory_space<vmem>>, vector<1x128xf32>,
    %c0_54 = arith.constant 0 : index
    %c0_55 = arith.constant 0 : index
    %126 = vector.load %arg15[%c0_54, %c0_55] : memref<128x128xf32, #tpu.memory_space<vmem>>, vector<128x128xf32>
    tpu.vector_store %arg15[%c0_54, %c0_55], %74 {strides = array<i32>} : memref<128x128xf32, #tpu.memory_space<vmem>>, vector<128x128xf32>,
    %c0_56 = arith.constant 0 : index
    %c0_57 = arith.constant 0 : index
    %127 = vector.load %arg16[%c0_56, %c0_57] : memref<1x128xf32, #tpu.memory_space<vmem>>, vector<1x128xf32>
    tpu.vector_store %arg16[%c0_56, %c0_57], %105 {strides = array<i32>} : memref<1x128xf32, #tpu.memory_space<vmem>>, vector<1x128xf32>,
    %128 = arith.addf %21, %52 : f32
    %129 = arith.addf %128, %83 : f32
    %130 = arith.addf %129, %114 : f32
    %cst_58 = arith.constant -742.502319 : f32
    %131 = arith.addf %130, %cst_58 : f32
    %c0_59 = arith.constant 0 : index
    %132 = memref.load %arg17[%c0_59] : memref<2xf32, #tpu.memory_space<smem>>
    memref.store %131, %arg17[%c0_59] : memref<2xf32, #tpu.memory_space<smem>>
    %133 = arith.addf %30, %61 : f32
    %134 = arith.addf %133, %92 : f32
    %135 = arith.addf %134, %123 : f32
    %cst_60 = arith.constant -742.502319 : f32
    %136 = arith.addf %135, %cst_60 : f32
    %c1 = arith.constant 1 : index
    %137 = memref.load %arg17[%c1] : memref<2xf32, #tpu.memory_space<smem>>
    memref.store %136, %arg17[%c1] : memref<2xf32, #tpu.memory_space<smem>>
    return
  }
  func.func @transform_0(%arg0: i32) -> (i32, i32) {
    %c0_i32 = arith.constant 0 : i32
    %c0_i32_0 = arith.constant 0 : i32
    %c0_i32_1 = arith.constant 0 : i32
    return %c0_i32, %c0_i32_0 : i32, i32
  }
  func.func @transform_1(%arg0: i32) -> (i32, i32) {
    %c0_i32 = arith.constant 0 : i32
    %c0_i32_0 = arith.constant 0 : i32
    %c0_i32_1 = arith.constant 0 : i32
    return %c0_i32, %c0_i32_0 : i32, i32
  }
  func.func @transform_2(%arg0: i32) -> (i32, i32) {
    %c0_i32 = arith.constant 0 : i32
    %c0_i32_0 = arith.constant 0 : i32
    %c0_i32_1 = arith.constant 0 : i32
    return %c0_i32, %c0_i32_0 : i32, i32
  }
  func.func @transform_3(%arg0: i32) -> (i32, i32) {
    %c0_i32 = arith.constant 0 : i32
    %c0_i32_0 = arith.constant 0 : i32
    %c0_i32_1 = arith.constant 0 : i32
    return %c0_i32, %c0_i32_0 : i32, i32
  }
  func.func @transform_4(%arg0: i32) -> (i32, i32) {
    %c0_i32 = arith.constant 0 : i32
    %c0_i32_0 = arith.constant 0 : i32
    %c0_i32_1 = arith.constant 0 : i32
    return %c0_i32, %c0_i32_0 : i32, i32
  }
  func.func @transform_5(%arg0: i32) -> (i32, i32) {
    %c0_i32 = arith.constant 0 : i32
    %c0_i32_0 = arith.constant 0 : i32
    %c0_i32_1 = arith.constant 0 : i32
    return %c0_i32, %c0_i32_0 : i32, i32
  }
  func.func @transform_6(%arg0: i32) -> (i32, i32) {
    %c0_i32 = arith.constant 0 : i32
    %c0_i32_0 = arith.constant 0 : i32
    %c0_i32_1 = arith.constant 0 : i32
    return %c0_i32, %c0_i32_0 : i32, i32
  }
  func.func @transform_7(%arg0: i32) -> (i32, i32) {
    %c0_i32 = arith.constant 0 : i32
    %c0_i32_0 = arith.constant 0 : i32
    %c0_i32_1 = arith.constant 0 : i32
    return %c0_i32, %c0_i32_0 : i32, i32
  }
  func.func @transform_8(%arg0: i32) -> (i32, i32) {
    %c0_i32 = arith.constant 0 : i32
    %c0_i32_0 = arith.constant 0 : i32
    %c0_i32_1 = arith.constant 0 : i32
    return %c0_i32, %c0_i32_0 : i32, i32
  }
  func.func @transform_9(%arg0: i32) -> (i32, i32) {
    %c0_i32 = arith.constant 0 : i32
    %c0_i32_0 = arith.constant 0 : i32
    %c0_i32_1 = arith.constant 0 : i32
    return %c0_i32, %c0_i32_0 : i32, i32
  }
  func.func @transform_10(%arg0: i32) -> (i32, i32) {
    %c0_i32 = arith.constant 0 : i32
    %c0_i32_0 = arith.constant 0 : i32
    %c0_i32_1 = arith.constant 0 : i32
    return %c0_i32, %c0_i32_0 : i32, i32
  }
  func.func @transform_11(%arg0: i32) -> (i32, i32) {
    %c0_i32 = arith.constant 0 : i32
    %c0_i32_0 = arith.constant 0 : i32
    %c0_i32_1 = arith.constant 0 : i32
    return %c0_i32, %c0_i32_0 : i32, i32
  }
  func.func @transform_12(%arg0: i32) -> (i32, i32) {
    %c0_i32 = arith.constant 0 : i32
    %c0_i32_0 = arith.constant 0 : i32
    %c0_i32_1 = arith.constant 0 : i32
    return %c0_i32, %c0_i32_0 : i32, i32
  }
  func.func @transform_13(%arg0: i32) -> (i32, i32) {
    %c0_i32 = arith.constant 0 : i32
    %c0_i32_0 = arith.constant 0 : i32
    %c0_i32_1 = arith.constant 0 : i32
    return %c0_i32, %c0_i32_0 : i32, i32
  }
  func.func @transform_14(%arg0: i32) -> (i32, i32) {
    %c0_i32 = arith.constant 0 : i32
    %c0_i32_0 = arith.constant 0 : i32
    %c0_i32_1 = arith.constant 0 : i32
    return %c0_i32, %c0_i32_0 : i32, i32
  }
  func.func @transform_15(%arg0: i32) -> (i32, i32) {
    %c0_i32 = arith.constant 0 : i32
    %c0_i32_0 = arith.constant 0 : i32
    %c0_i32_1 = arith.constant 0 : i32
    return %c0_i32, %c0_i32_0 : i32, i32
  }
  func.func @transform_16(%arg0: i32) -> i32 {
    %c0_i32 = arith.constant 0 : i32
    %c0_i32_0 = arith.constant 0 : i32
    return %c0_i32 : i32
  }
}

</mosaic_0001>

<bundles_post_ra>
// kernel: tpu_custom_call.1
= control target key start
LH: loop header
LB: loop body
LE: loop exit
PB: predicated region body
PF: predicated region fallthrough
CT: control target
= control target key end

     0   :  { %s3269_s0 = inlined_call_operand.hbm [shape: f32[128,128], index: 0, kind: input, shape index: {}]   ;;  %s3270_s1 = inlined_call_operand.hbm [shape: f32[128,128], index: 1, kind: input, shape index: {}]   ;;  %s3271_s2 = inlined_call_operand.vmem [shape: f32[1,128], index: 2, kind: input, shape index: {}]   ;;  %s3272_s3 = inlined_call_operand.vmem [shape: f32[1,128], index: 3, kind: input, shape index: {}]   ;;  %s3273_s4 = inlined_call_operand.hbm [shape: f32[128,128], index: 4, kind: input, shape index: {}]   ;;  %s3274_s5 = inlined_call_operand.hbm [shape: f32[128,128], index: 5, kind: input, shape index: {}]   ;;  %s3275_s6 = inlined_call_operand.vmem [shape: f32[1,128], index: 6, kind: input, shape index: {}]   ;;  %s3276_s7 = inlined_call_operand.vmem [shape: f32[1,128], index: 7, kind: input, shape index: {}]   ;;  %s3277_s8 = inlined_call_operand.hbm [shape: f32[128,128], index: 8, kind: input, shape index: {}]   ;;  %s3278_s9 = inlined_call_operand.vmem [shape: f32[1,128], index: 9, kind: input, shape index: {}]   ;;  %s3279_s10 = inlined_call_operand.hbm [shape: f32[128,128], index: 10, kind: input, shape index: {}]   ;;  %s3280_s11 = inlined_call_operand.vmem [shape: f32[1,128], index: 11, kind: input, shape index: {}]   ;;  %s3281_s12 = inlined_call_operand.hbm [shape: f32[128,128], index: 12, kind: output, shape index: {0}]   ;;  %s3282_s13 = inlined_call_operand.hbm [shape: f32[1,128], index: 13, kind: output, shape index: {1}]   ;;  %s3283_s14 = inlined_call_operand.hbm [shape: f32[128,128], index: 14, kind: output, shape index: {2}]   ;;  %s3284_s15 = inlined_call_operand.hbm [shape: f32[1,128], index: 15, kind: output, shape index: {3}]   ;;  %s3285_s16 = inlined_call_operand.hbm [shape: f32[2], index: 16, kind: output, shape index: {4}]  }
   0x1   :  { %3315 = sst [smem:[#allocation56_spill]] %s3269_s0 }
   0x2   :  { %3316 = sst [smem:[#allocation57_spill]] %s3285_s16 }
   0x3   :  { %22 = vsyncpa [#allocation3], 0 }
   0x4   :  { %23 = vsyncpa [#allocation7], 0 }
   0x5   :  { %24 = vsyncpa [#allocation10], 0 }
   0x6   :  { %25 = vsyncpa [#allocation13], 0 }
   0x7   :  { %26 = vsyncpa [#allocation4], 0 }
   0x8   :  { %27 = vsyncpa [#allocation16], 0 }
   0x9   :  { %28 = vsyncpa [#allocation19], 0 }
   0xa   :  { %29 = vsyncpa [#allocation5], 0  ;;  %s1836_s21 = smov [#allocation6]   ;;  %s1837_s23 = smov [#allocation9]  }
   0xb   :  { %s47_s22 = sshll.u32 %s1836_s21, 4  ;;  %s75_s24 = sshll.u32 %s1837_s23, 4  ;;  %s48_s22 = int_to_ptr.vmem [resolvable:$true] %s47_s22  ;;  %s1934_s24 = int_to_ptr.vmem [resolvable:$true] %s75_s24 }
   0xc   :  { %s1590_s27 = scalar_lea.hbm %s3270_s1, 2048 }
   0xd   :  { %p1591_p0 = scmp.ne.s32.totalorder %s3270_s1, %s1590_s27  ;;  %p1594_p1 = scmp.lt.u32.totalorder %s1590_s27, %s3270_s1 }
   0xf   :  { %p1596_p2 = pnand %p1594_p1, %p1591_p0 }
  0x11   :  { %1599 = shalt.err (!%p1596_p2)
}
  0x12   :  { %s1600_s17 = scalar_lea.vmem %s48_s22, 2048  ;;  %p1605_p4 = scmp.lt.s32.totalorder %s48_s22, %s48_s22 }
  0x13   :  { %p1601_p3 = scmp.ne.s32.totalorder %s48_s22, %s1600_s17  ;;  %p1606_p5 = scmp.lt.s32.totalorder %s1600_s17, %s1600_s17 }
  0x15   :  { %p1607_p6 = por %p1606_p5, %p1605_p4 }
  0x17   :  { %p1608_p7 = pnand %p1607_p6, %p1601_p3 }
  0x19   :  { %1611 = shalt.err (!%p1608_p7)
}
  0x1a   :  { %s1838_s18 = smov 128   ;;  %s1839_s19 = smov 8  }
  0x1b   :  { %53 = dma.hbm_to_vmem [thread:$0]  %s3270_s1, 2048, %s48_s22, [#allocation7], %s1838_s18, %s1838_s18, %s1839_s19  }
  0x1c   :  { %s1612_s26 = scalar_lea.hbm %s3274_s5, 2048 }
  0x1d   :  { %p1613_p8 = scmp.ne.s32.totalorder %s3274_s5, %s1612_s26  ;;  %p1616_p9 = scmp.lt.u32.totalorder %s1612_s26, %s3274_s5 }
  0x1f   :  { %p1618_p10 = pnand %p1616_p9, %p1613_p8 }
  0x21   :  { %1621 = shalt.err (!%p1618_p10)
}
  0x22   :  { %s1622_s0 = scalar_lea.vmem %s1934_s24, 2048  ;;  %p1627_p12 = scmp.lt.s32.totalorder %s1934_s24, %s1934_s24 }
  0x23   :  { %p1623_p11 = scmp.ne.s32.totalorder %s1934_s24, %s1622_s0  ;;  %p1628_p13 = scmp.lt.s32.totalorder %s1622_s0, %s1622_s0 }
  0x25   :  { %p1629_p0 = por %p1628_p13, %p1627_p12 }
  0x27   :  { %p1630_p1 = pnand %p1629_p0, %p1623_p11 }
  0x29   :  { %1633 = shalt.err (!%p1630_p1)
}
  0x2a   :  { %81 = dma.hbm_to_vmem [thread:$0]  %s3274_s5, 2048, %s1934_s24, [#allocation10], %s1838_s18, %s1838_s18, %s1839_s19  }
  0x2b   :  { %s1840_s17 = smov [#allocation2]   ;;  %s1841_s21 = smov [#allocation8]  }
  0x2c   :  { %s35_s20 = sshll.u32 %s1840_s17, 4  ;;  %s63_s23 = sshll.u32 %s1841_s21, 4  ;;  %s36_s20 = int_to_ptr.vmem [resolvable:$true] %s35_s20  ;;  %s1971_s23 = int_to_ptr.vmem [resolvable:$true] %s63_s23 }
  0x2d   :  { %s3317_s27 = sld [smem:[#allocation56_spill]] }
  0x33   :  { %s1634_s28 = scalar_lea.hbm %s3317_s27, 2048 }
  0x34   :  { %p1635_p2 = scmp.ne.s32.totalorder %s3317_s27, %s1634_s28  ;;  %p1638_p3 = scmp.lt.u32.totalorder %s1634_s28, %s3317_s27 }
  0x36   :  { %p1640_p4 = pnand %p1638_p3, %p1635_p2 }
  0x38   :  { %1643 = shalt.err (!%p1640_p4)
}
  0x39   :  { %s1644_s5 = scalar_lea.vmem %s36_s20, 2048  ;;  %p1649_p6 = scmp.lt.s32.totalorder %s36_s20, %s36_s20 }
  0x3a   :  { %p1645_p5 = scmp.ne.s32.totalorder %s36_s20, %s1644_s5  ;;  %p1650_p7 = scmp.lt.s32.totalorder %s1644_s5, %s1644_s5 }
  0x3c   :  { %p1651_p8 = por %p1650_p7, %p1649_p6 }
  0x3e   :  { %p1652_p9 = pnand %p1651_p8, %p1645_p5 }
  0x40   :  { %1655 = shalt.err (!%p1652_p9)
}
  0x41   :  { %41 = dma.hbm_to_vmem [thread:$0]  %s3317_s27, 2048, %s36_s20, [#allocation3], %s1838_s18, %s1838_s18, %s1839_s19  }
  0x42   :  { %s1656_s16 = scalar_lea.hbm %s3273_s4, 2048 }
  0x43   :  { %p1657_p10 = scmp.ne.s32.totalorder %s3273_s4, %s1656_s16  ;;  %p1660_p11 = scmp.lt.u32.totalorder %s1656_s16, %s3273_s4 }
  0x45   :  { %p1662_p12 = pnand %p1660_p11, %p1657_p10 }
  0x47   :  { %1665 = shalt.err (!%p1662_p12)
}
  0x48   :  { %s1666_s29 = scalar_lea.vmem %s1971_s23, 2048  ;;  %p1671_p0 = scmp.lt.s32.totalorder %s1971_s23, %s1971_s23 }
  0x49   :  { %p1667_p13 = scmp.ne.s32.totalorder %s1971_s23, %s1666_s29  ;;  %p1672_p1 = scmp.lt.s32.totalorder %s1666_s29, %s1666_s29 }
  0x4b   :  { %p1673_p2 = por %p1672_p1, %p1671_p0 }
  0x4d   :  { %p1674_p3 = pnand %p1673_p2, %p1667_p13 }
  0x4f   :  { %1677 = shalt.err (!%p1674_p3)
}
  0x50   :  { %69 = dma.hbm_to_vmem [thread:$0]  %s3273_s4, 2048, %s1971_s23, [#allocation7], %s1838_s18, %s1838_s18, %s1839_s19  }
  0x51   :  { %s1842_s30 = smov [#allocation11]   ;;  %s1843_s5 = smov [#allocation12]  }
  0x52   :  { %s91_s0 = sshll.u32 %s1842_s30, 4  ;;  %s105_s24 = sshll.u32 %s1843_s5, 4  ;;  %s92_s0 = int_to_ptr.vmem [resolvable:$true] %s91_s0  ;;  %s2008_s24 = int_to_ptr.vmem [resolvable:$true] %s105_s24 }
  0x53   :  { %s1678_s17 = scalar_lea.hbm %s3277_s8, 2048 }
  0x54   :  { %p1679_p4 = scmp.ne.s32.totalorder %s3277_s8, %s1678_s17  ;;  %p1682_p5 = scmp.lt.u32.totalorder %s1678_s17, %s3277_s8 }
  0x56   :  { %p1684_p6 = pnand %p1682_p5, %p1679_p4 }
  0x58   :  { %1687 = shalt.err (!%p1684_p6)
}
  0x59   :  { %s1688_s4 = scalar_lea.vmem %s92_s0, 2048  ;;  %p1693_p8 = scmp.lt.s32.totalorder %s92_s0, %s92_s0 }
  0x5a   :  { %p1689_p7 = scmp.ne.s32.totalorder %s92_s0, %s1688_s4  ;;  %p1694_p9 = scmp.lt.s32.totalorder %s1688_s4, %s1688_s4 }
  0x5c   :  { %p1695_p10 = por %p1694_p9, %p1693_p8 }
  0x5e   :  { %p1696_p11 = pnand %p1695_p10, %p1689_p7 }
  0x60   :  { %1699 = shalt.err (!%p1696_p11)
}
  0x61   :  { %97 = dma.hbm_to_vmem [thread:$0]  %s3277_s8, 2048, %s92_s0, [#allocation10], %s1838_s18, %s1838_s18, %s1839_s19  }
  0x62   :  { %s1700_s27 = scalar_lea.hbm %s3279_s10, 2048 }
  0x63   :  { %p1701_p12 = scmp.ne.s32.totalorder %s3279_s10, %s1700_s27  ;;  %p1704_p13 = scmp.lt.u32.totalorder %s1700_s27, %s3279_s10 }
  0x65   :  { %p1706_p0 = pnand %p1704_p13, %p1701_p12 }
  0x67   :  { %1709 = shalt.err (!%p1706_p0)
}
  0x68   :  { %s1710_s17 = scalar_lea.vmem %s2008_s24, 2048  ;;  %p1715_p2 = scmp.lt.s32.totalorder %s2008_s24, %s2008_s24 }
  0x69   :  { %p1711_p1 = scmp.ne.s32.totalorder %s2008_s24, %s1710_s17  ;;  %p1716_p3 = scmp.lt.s32.totalorder %s1710_s17, %s1710_s17 }
  0x6b   :  { %p1717_p4 = por %p1716_p3, %p1715_p2 }
  0x6d   :  { %p1718_p5 = pnand %p1717_p4, %p1711_p1 }
  0x6f   :  { %1721 = shalt.err (!%p1718_p5)
}
  0x70   :  { %111 = dma.hbm_to_vmem [thread:$0]  %s3279_s10, 2048, %s2008_s24, [#allocation13], %s1838_s18, %s1838_s18, %s1839_s19  }
  0x71   :  { %1820 = dma.done.wait [#allocation3], 2048  }
  0x72   :  { %1821 = vsyncadd [#allocation3], 4294965248 }
  0x73   :  { %1822 = dma.done.wait [#allocation7], 4096  }
  0x74   :  { %1823 = vsyncadd [#allocation7], 4294963200 }
  0x75   :  { %1824 = dma.done.wait [#allocation10], 4096  }
  0x76   :  { %1825 = vsyncadd [#allocation10], 4294963200 }
  0x77   :  { %1826 = dma.done.wait [#allocation13], 2048  }
  0x78   :  { %1827 = vsyncadd [#allocation13], 4294965248  ;;  %v2048_v0 = vld [vmem:[%s3272_s3] sm:$0x1]  ;;  %v2060_v8 = vld [vmem:[#allocation6 + $0x8] sm:$0xff]  ;;  %vm653_vm1 = vcmask 1040384  }
  0x79   :  { %v632_v1 = vand.u32 2147483647, %v2048_v0  ;;  %v2054_v4 = vld [vmem:[%s3278_s9] sm:$0x1]  ;;  %v2062_v9 = vld [vmem:[#allocation6 + $0x10] sm:$0xff]  ;;  %v631_v10 = vmax.f32 %v2048_v0, 0.0 }
  0x7a   :  { %v648_v5 = vmul.f32 %v2054_v4, %v2054_v4  ;;  %v2058_v6 = vld [vmem:[#allocation6] sm:$0xff]  ;;  %v2067_v13 = vld [vmem:[#allocation6 + $0x18] sm:$0xff]  ;;  %v2071_v15 = vld [vmem:[#allocation6 + $0x28] sm:$0xff]  ;;  %v181_v17 = vmax.f32 %v2060_v8, 0.0  ;;  %v197_v21 = vand.u32 2147483647, %v2060_v8 }
  0x7b   :  { %v633_v2 = vsub.f32 0.0, %v632_v1  ;;  %v2069_v14 = vld [vmem:[#allocation6 + $0x20] sm:$0xff]  ;;  %v180_v16 = vmax.f32 %v2058_v6, 0.0  ;;  %v196_v18 = vand.u32 2147483647, %v2058_v6  ;;  %v2076_v20 = vld [vmem:[#allocation6 + $0x30] sm:$0xff] }
  0x7c   :  { %v2065_v12 = vmul.f32 -0.5, %v648_v5  ;;  %v198_v22 = vand.u32 2147483647, %v2062_v9  ;;  %v2080_v24 = vld [vmem:[#allocation6 + $0x38] sm:$0xff]  ;;  %v199_v27 = vand.u32 2147483647, %v2067_v13 }
  0x7d   :  { %v634_v3 = vmul.f32 1.442695, %v633_v2  ;;  %v2085_v28 = vld [vmem:[#allocation6 + $0x40] sm:$0xff]  ;;  %v2087_v29 = vld [vmem:[#allocation6 + $0x48] sm:$0xff]  ;;  %v200_v32 = vand.u32 2147483647, %v2069_v14 }
  0x7e   :  { %v2092_v33 = vld [vmem:[#allocation6 + $0x50] sm:$0xff]  ;;  %v2094_v34 = vld [vmem:[#allocation6 + $0x58] sm:$0xff]  ;;  %v201_v37 = vand.u32 2147483647, %v2071_v15  ;;  %v2103_v39 = vld [vmem:[#allocation6 + $0x60] sm:$0xff]  ;;  %v212_v40 = vsub.f32 0.0, %v196_v18 }
  0x7f   :  { %1372 = vpow2.f32 %v634_v3  ;;  %v213_v41 = vsub.f32 0.0, %v197_v21  ;;  %v214_v42 = vsub.f32 0.0, %v198_v22  ;;  %v202_v44 = vand.u32 2147483647, %v2076_v20  ;;  %v2107_v47 = vld [vmem:[#allocation6 + $0x68] sm:$0xff]  ;;  %v2111_v51 = vld [vmem:[#allocation6 + $0x70] sm:$0xff] }
  0x80   :  { %v203_v45 = vand.u32 2147483647, %v2080_v24  ;;  %v215_v46 = vsub.f32 0.0, %v199_v27  ;;  %v204_v48 = vand.u32 2147483647, %v2085_v28  ;;  %v216_v50 = vsub.f32 0.0, %v200_v32 }
  0x81   :  { %v205_v49 = vand.u32 2147483647, %v2087_v29  ;;  %v206_v52 = vand.u32 2147483647, %v2092_v33  ;;  %v207_v53 = vand.u32 2147483647, %v2094_v34 }
  0x82   :  { %v217_v54 = vsub.f32 0.0, %v201_v37  ;;  %v228_v55 = vmul.f32 1.442695, %v212_v40  ;;  %v230_v56 = vmul.f32 1.442695, %v213_v41  ;;  %v2115_v59 = vld [vmem:[#allocation6 + $0x78] sm:$0xff] }
  0x83   :  { %v232_v57 = vmul.f32 1.442695, %v214_v42  ;;  %v208_v60 = vand.u32 2147483647, %v2103_v39  ;;  %v218_v61 = vsub.f32 0.0, %v202_v44  ;;  %v219_v2 = vsub.f32 0.0, %v203_v45 }
  0x84   :  { %v234_v62 = vmul.f32 1.442695, %v215_v46  ;;  %v209_v1 = vand.u32 2147483647, %v2107_v47  ;;  %v236_v3 = vmul.f32 1.442695, %v216_v50 }
  0x85   :  { %v238_v18 = vmul.f32 1.442695, %v217_v54  ;;  %v221_v21 = vsub.f32 0.0, %v205_v49  ;;  %v240_v27 = vmul.f32 1.442695, %v218_v61  ;;  %v223_v37 = vsub.f32 0.0, %v207_v53 }
  0x86   :  { %v242_v40 = vmul.f32 1.442695, %v219_v2  ;;  %v628_v41 = vld [vmem:[%s3271_s2] sm:$0x1]  ;;  %v225_v45 = vsub.f32 0.0, %v209_v1  ;;  %v3354_v8 = vmax.f32 %v2067_v13, 0.0 }
  0x87   :  { %v246_v46 = vmul.f32 1.442695, %v221_v21  ;;  %v147_v6 = vld [vmem:[#allocation2 + $0x78] sm:$0xff]  ;;  %s1845_s28 = smov [#allocation14]  }
  0x88   :  { %s1272_s29 = sshll.u32 %s1845_s28, 4  ;;  %s1273_s29 = int_to_ptr.vmem [resolvable:$true] %s1272_s29 }
  0x89   :  { %v1373_v7 = vpop.eup %1372 }
  0x8a   :  { %v636_v11 = vadd.f32 1.0, %v1373_v7  ;;  %v642_v19 = vand.u32 2147483647, %v1373_v7  ;;  %v639_v23 = vmul.f32 -0.5, %v1373_v7 }
  0x8c   :  { %1374 = vlog2.f32 %v636_v11  ;;  %vm2099_vm0 = vcmp.lt.f32.partialorder %v642_v19, 0.0004427343  ;;  %v640_v43 = vadd.f32 1.0, %v639_v23  ;;  %v220_v11 = vsub.f32 0.0, %v204_v48 }
  0x8d   :  { %1376 = vpow2.f32 %v228_v55  ;;  %v210_v19 = vand.u32 2147483647, %v2111_v51  ;;  %v222_v23 = vsub.f32 0.0, %v206_v52  ;;  %v250_v52 = vmul.f32 1.442695, %v223_v37 }
  0x8e   :  { %v641_v58 = vmul.f32 %v1373_v7, %v640_v43  ;;  %1378 = vpow2.f32 %v230_v56  ;;  %v211_v7 = vand.u32 2147483647, %v2115_v59  ;;  %v224_v43 = vsub.f32 0.0, %v208_v60 }
  0x8f   :  { %1380 = vpow2.f32 %v232_v57  ;;  %v244_v38 = vmul.f32 1.442695, %v220_v11  ;;  %v248_v48 = vmul.f32 1.442695, %v222_v23 }
  0x90   :  { %1382 = vpow2.f32 %v234_v62  ;;  %v227_v50 = vsub.f32 0.0, %v211_v7  ;;  %v252_v55 = vmul.f32 1.442695, %v224_v43 }
  0x91   :  { %1384 = vpow2.f32 %v236_v3 }
  0x92   :  { %1386 = vpow2.f32 %v238_v18  ;;  %v258_v3 = vmul.f32 1.442695, %v227_v50 }
  0x96   :  { %v1375_v63 = vpop.eup %1374 }
  0x97   :  { %v638_v5 = vmul.f32 0.6931472, %v1375_v63  ;;  %v1377_v56 = vpop.eup %1376 }
  0x98   :  { %v1379_v60 = vpop.eup %1378  ;;  %v263_v63 = vmul.f32 -0.5, %v1377_v56  ;;  %v266_v37 = vand.u32 2147483647, %v1377_v56 }
  0x99   :  { %v644_v22 = vsel %vm2099_vm0, %v641_v58, %v638_v5  ;;  %v254_v58 = vmul.f32 1.442695, %v225_v45  ;;  %v1381_v1 = vpop.eup %1380  ;;  %v272_v5 = vmul.f32 -0.5, %v1379_v60  ;;  %v275_v45 = vand.u32 2147483647, %v1379_v60 }
  0x9a   :  { %v645_v32 = vadd.f32 %v644_v22, %v631_v10  ;;  %v226_v10 = vsub.f32 0.0, %v210_v19  ;;  %v1383_v11 = vpop.eup %1382  ;;  %v260_v19 = vadd.f32 1.0, %v1377_v56  ;;  %v264_v7 = vadd.f32 1.0, %v263_v63 }
  0x9b   :  { %v2136_v21 = vpop.eup %1384  ;;  %v293_v63 = vand.u32 2147483647, %v1383_v11  ;;  %vm2154_vm2 = vcmp.lt.f32.partialorder %v266_v37, 0.0004427343  ;;  %vm2164_vm3 = vcmp.lt.f32.partialorder %v275_v45, 0.0004427343 }
  0x9c   :  { %v646_v44 = vmul.f32 %v645_v32, %v2054_v4  ;;  %1388 = vlog2.f32 %v645_v32  ;;  %v256_v62 = vmul.f32 1.442695, %v226_v10  ;;  %v2139_v32 = vpop.eup %1386  ;;  %v302_v37 = vand.u32 2147483647, %v2136_v21 }
  0x9d   :  { %1390 = vpow2.f32 %v240_v27  ;;  %v269_v27 = vadd.f32 1.0, %v1379_v60  ;;  %vm2182_vm5 = vcmp.lt.f32.partialorder %v293_v63, 0.0004427343 }
  0x9e   :  { %v647_v49 = vadd.f32 %v646_v44, %v628_v41  ;;  %1392 = vpow2.f32 %v242_v40  ;;  %v278_v40 = vadd.f32 1.0, %v1381_v1  ;;  %v281_v41 = vmul.f32 -0.5, %v1381_v1 }
  0x9f   :  { %1394 = vpow2.f32 %v244_v38  ;;  %v273_v44 = vadd.f32 1.0, %v272_v5  ;;  %vm2192_vm6 = vcmp.lt.f32.partialorder %v302_v37, 0.0004427343 }
  0xa0   :  { %v664_v4 = vmul.f32 %v647_v49, %v647_v49  ;;  %1237 = vst [vmem:[#allocation15] sm:$0x1] %v647_v49  ;;  %1396 = vpow2.f32 %v246_v46  ;;  %v287_v49 = vadd.f32 1.0, %v1383_v11 }
  0xa1   :  { %1398 = vpow2.f32 %v248_v48  ;;  %v2144_v48 = vmul.f32 %v1377_v56, %v264_v7  ;;  %v2158_v5 = vmul.f32 %v1379_v60, %v273_v44  ;;  %v299_v7 = vmul.f32 -0.5, %v2136_v21  ;;  %v148_v56 = vld [vmem:[#allocation11] sm:$0xff] }
  0xa2   :  { %v665_v2 = vsub.f32 0.0, %v664_v4  ;;  %1400 = vpow2.f32 %v250_v52  ;;  %v282_v52 = vadd.f32 1.0, %v281_v41  ;;  %v290_v4 = vmul.f32 -0.5, %v1383_v11 }
  0xa3   :  { %1402 = vpow2.f32 %v252_v55  ;;  %v284_v55 = vand.u32 2147483647, %v1381_v1  ;;  %v311_v44 = vand.u32 2147483647, %v2139_v32 }
  0xa4   :  { %v666_v22 = vmul.f32 0.5, %v665_v2  ;;  %1404 = vpow2.f32 %v254_v58  ;;  %v296_v2 = vadd.f32 1.0, %v2136_v21  ;;  %v2172_v60 = vmul.f32 %v1381_v1, %v282_v52 }
  0xa5   :  { %1406 = vpow2.f32 %v256_v62  ;;  %vm2178_vm4 = vcmp.lt.f32.partialorder %v284_v55, 0.0004427343  ;;  %vm2206_vm7 = vcmp.lt.f32.partialorder %v311_v44, 0.0004427343 }
  0xa6   :  { %v1389_v43 = vpop.eup %1388  ;;  %v667_v38 = vsel %vm653_vm1, %v666_v22, 0.0  ;;  %1408 = vpow2.f32 %v258_v3 }
  0xa7   :  { %v2142_v46 = vpop.eup %1390  ;;  %668 = vadd.xlane.f32.xlu1 %v667_v38  ;;  %v651_v10 = vmul.f32 0.6931472, %v1389_v43  ;;  %1410 = vlog2.f32 %v260_v19  ;;  %v291_v19 = vadd.f32 1.0, %v290_v4  ;;  %v300_v43 = vadd.f32 1.0, %v299_v7 }
  0xa8   :  { %v2146_v50 = vpop.eup %1392  ;;  %1412 = vlog2.f32 %v269_v27  ;;  %v308_v38 = vmul.f32 -0.5, %v2139_v32  ;;  %v314_v4 = vadd.f32 1.0, %v2142_v46  ;;  %v317_v1 = vmul.f32 -0.5, %v2142_v46 }
  0xa9   :  { %v2148_v58 = vpop.eup %1394  ;;  %v652_v62 = vsub.f32 %v2065_v12, %v651_v10  ;;  %1414 = vlog2.f32 %v278_v40  ;;  %v305_v40 = vadd.f32 1.0, %v2139_v32  ;;  %v320_v7 = vand.u32 2147483647, %v2142_v46 }
  0xaa   :  { %v2152_v3 = vpop.eup %1396  ;;  %1416 = vlog2.f32 %v287_v49  ;;  %v309_v55 = vadd.f32 1.0, %v308_v38  ;;  %v326_v23 = vmul.f32 -0.5, %v2146_v50  ;;  %v329_v37 = vand.u32 2147483647, %v2146_v50 }
  0xab   :  { %v2161_v22 = vpop.eup %1398  ;;  %v654_v12 = vsel %vm653_vm1, %v652_v62, 0.0  ;;  %1418 = vlog2.f32 %v296_v2  ;;  %v2190_v62 = vmul.f32 %v1383_v11, %v291_v19  ;;  %v2204_v11 = vmul.f32 %v2136_v21, %v300_v43 }
  0xac   :  { %v2170_v41 = vpop.eup %1400  ;;  %655 = vadd.xlane.f32.xlu1 %v654_v12  ;;  %1420 = vlog2.f32 %v305_v40  ;;  %v318_v12 = vadd.f32 1.0, %v317_v1  ;;  %v323_v40 = vadd.f32 1.0, %v2146_v50  ;;  %v332_v38 = vadd.f32 1.0, %v2148_v58 }
  0xad   :  { %v2176_v10 = vpop.eup %1402  ;;  %1422 = vlog2.f32 %v314_v4  ;;  %v2213_v4 = vmul.f32 %v2139_v32, %v309_v55  ;;  %v327_v1 = vadd.f32 1.0, %v326_v23  ;;  %v335_v57 = vmul.f32 -0.5, %v2148_v58 }
  0xae   :  { %v2188_v52 = vpop.eup %1404  ;;  %1424 = vlog2.f32 %v323_v40  ;;  %vm2218_vm8 = vcmp.lt.f32.partialorder %v320_v7, 0.0004427343  ;;  %v338_v43 = vand.u32 2147483647, %v2148_v58  ;;  %v2226_v32 = vmul.f32 %v2142_v46, %v318_v12 }
  0xaf   :  { %v2197_v63 = vpop.eup %1406  ;;  %1426 = vlog2.f32 %v332_v38  ;;  %v336_v55 = vadd.f32 1.0, %v335_v57  ;;  %v341_v23 = vadd.f32 1.0, %v2152_v3  ;;  %vm2234_vm9 = vcmp.lt.f32.partialorder %v329_v37, 0.0004427343 }
  0xb0   :  { %v2201_v18 = vpop.eup %1408  ;;  %v344_v38 = vmul.f32 -0.5, %v2152_v3  ;;  %vm2245_vm10 = vcmp.lt.f32.partialorder %v338_v43, 0.0004427343  ;;  %v350_v43 = vadd.f32 1.0, %v2161_v22  ;;  %v377_v21 = vadd.f32 1.0, %v2188_v52 }
  0xb1   :  { %v1411_v61 = vpop.eup %1410  ;;  %1428 = vlog2.f32 %v341_v23  ;;  %v2257_v35 = vmul.f32 %v2148_v58, %v336_v55  ;;  %v356_v23 = vand.u32 2147483647, %v2161_v22 }
  0xb2   :  { %v1413_v54 = vpop.eup %1412  ;;  %v2216_v53 = vmul.f32 0.6931472, %v1411_v61  ;;  %v2232_v61 = vmul.f32 %v2146_v50, %v327_v1  ;;  %v345_v1 = vadd.f32 1.0, %v344_v38  ;;  %1430 = vlog2.f32 %v350_v43 }
  0xb3   :  { %v1415_v44 = vpop.eup %1414  ;;  %v2223_v0 = vmul.f32 0.6931472, %v1413_v54  ;;  %vm2292_vm12 = vcmp.lt.f32.partialorder %v356_v23, 0.0004427343  ;;  %v3359_v43 = vmax.f32 %v2071_v15, 0.0 }
  0xb4   :  { %v1417_v40 = vpop.eup %1416  ;;  %v2229_v42 = vmul.f32 0.6931472, %v1415_v44  ;;  %v268_v57 = vsel %vm2154_vm2, %v2144_v48, %v2216_v53  ;;  %v347_v44 = vand.u32 2147483647, %v2152_v3  ;;  %v2284_v49 = vmul.f32 %v2152_v3, %v345_v1 }
  0xb5   :  { %v1419_v54 = vpop.eup %1418  ;;  %v2243_v46 = vmul.f32 0.6931472, %v1417_v40  ;;  %v277_v50 = vsel %vm2164_vm3, %v2158_v5, %v2223_v0  ;;  %v353_v40 = vmul.f32 -0.5, %v2161_v22  ;;  %v371_v3 = vmul.f32 -0.5, %v2176_v10  ;;  %v149_v0 = vld [vmem:[#allocation11 + $0x8] sm:$0xff] }
  0xb6   :  { %v2253_v37 = vmul.f32 0.6931472, %v1419_v54  ;;  %v1421_v36 = vpop.eup %1420  ;;  %v286_v31 = vsel %vm2178_vm4, %v2172_v60, %v2229_v42  ;;  %vm2276_vm11 = vcmp.lt.f32.partialorder %v347_v44, 0.0004427343  ;;  %v359_v42 = vadd.f32 1.0, %v2170_v41 }
  0xb7   :  { %v295_v38 = vsel %vm2182_vm5, %v2190_v62, %v2243_v46  ;;  %v2274_v55 = vmul.f32 0.6931472, %v1421_v36  ;;  %v1423_v54 = vpop.eup %1422  ;;  %v354_v45 = vadd.f32 1.0, %v353_v40  ;;  %v362_v62 = vmul.f32 -0.5, %v2170_v41 }
  0xb8   :  { %v2281_v60 = vmul.f32 0.6931472, %v1423_v54  ;;  %v365_v46 = vand.u32 2147483647, %v2170_v41  ;;  %v1425_v36 = vpop.eup %1424  ;;  %1432 = vlog2.f32 %v359_v42  ;;  %v368_v40 = vadd.f32 1.0, %v2176_v10 }
  0xb9   :  { %v313_v44 = vsel %vm2206_vm7, %v2213_v4, %v2274_v55  ;;  %v1427_v1 = vpop.eup %1426  ;;  %v325_v58 = vmul.f32 0.6931472, %v1425_v36  ;;  %v2303_v26 = vmul.f32 %v2161_v22, %v354_v45  ;;  %v363_v19 = vadd.f32 1.0, %v362_v62  ;;  %v135_v36 = vld [vmem:[#allocation2 + $0x18] sm:$0xff] }
  0xba   :  { %v322_v54 = vsel %vm2218_vm8, %v2226_v32, %v2281_v60  ;;  %v334_v4 = vmul.f32 0.6931472, %v1427_v1  ;;  %1434 = vlog2.f32 %v368_v40  ;;  %v372_v23 = vadd.f32 1.0, %v371_v3 }
  0xbb   :  { %v374_v55 = vand.u32 2147483647, %v2176_v10  ;;  %v331_v42 = vsel %vm2234_vm9, %v2232_v61, %v325_v58  ;;  %vm2309_vm13 = vcmp.lt.f32.partialorder %v365_v46, 0.0004427343  ;;  %v380_v32 = vmul.f32 -0.5, %v2188_v52  ;;  %v1429_v22 = vpop.eup %1428 }
  0xbc   :  { %v340_v45 = vsel %vm2245_vm10, %v2257_v35, %v334_v4  ;;  %v364_v60 = vmul.f32 %v2170_v41, %v363_v19  ;;  %v2320_v62 = vmul.f32 %v2176_v10, %v372_v23  ;;  %v383_v61 = vand.u32 2147483647, %v2188_v52  ;;  %v1431_v1 = vpop.eup %1430 }
  0xbd   :  { %v343_v7 = vmul.f32 0.6931472, %v1429_v22  ;;  %1436 = vlog2.f32 %v377_v21  ;;  %v381_v58 = vadd.f32 1.0, %v380_v32  ;;  %v386_v46 = vadd.f32 1.0, %v2197_v63  ;;  %v146_v21 = vld [vmem:[#allocation2 + $0x70] sm:$0xff] }
  0xbe   :  { %vm2324_vm14 = vcmp.lt.f32.partialorder %v374_v55, 0.0004427343  ;;  %v389_v40 = vmul.f32 -0.5, %v2197_v63  ;;  %v392_v35 = vand.u32 2147483647, %v2197_v63  ;;  %v395_v41 = vadd.f32 1.0, %v2201_v18 }
  0xbf   :  { %v349_v10 = vsel %vm2276_vm11, %v2284_v49, %v343_v7  ;;  %vm2334_vm15 = vcmp.lt.f32.partialorder %v383_v61, 0.0004427343  ;;  %1438 = vlog2.f32 %v386_v46  ;;  %v398_v3 = vmul.f32 -0.5, %v2201_v18  ;;  %v153_v61 = vld [vmem:[#allocation11 + $0x28] sm:$0xff]  ;;  %v155_v46 = vld [vmem:[#allocation11 + $0x38] sm:$0xff] }
  0xc0   :  { %v2340_v19 = vmul.f32 %v2188_v52, %v381_v58  ;;  %v390_v4 = vadd.f32 1.0, %v389_v40  ;;  %1440 = vlog2.f32 %v395_v41  ;;  %v401_v23 = vand.u32 2147483647, %v2201_v18  ;;  %v154_v58 = vld [vmem:[#allocation11 + $0x30] sm:$0xff]  ;;  %v156_v40 = vld [vmem:[#allocation11 + $0x40] sm:$0xff] }
  0xc1   :  { %v352_v55 = vmul.f32 0.6931472, %v1431_v1  ;;  %vm2343_vm0 = vcmp.lt.f32.partialorder %v392_v35, 0.0004427343  ;;  %v399_v30 = vadd.f32 1.0, %v398_v3  ;;  %v2354_v49 = vadd.f32 %v268_v57, %v180_v16  ;;  %v158_v41 = vld [vmem:[#allocation11 + $0x50] sm:$0xff] }
  0xc2   :  { %v2363_v52 = vadd.f32 %v277_v50, %v181_v17  ;;  %v1433_v32 = vpop.eup %1432  ;;  %v2366_v22 = vmul.f32 %v2197_v63, %v390_v4  ;;  %vm2368_vm4 = vcmp.lt.f32.partialorder %v401_v23, 0.0004427343  ;;  %v3352_v16 = vmax.f32 %v2062_v9, 0.0  ;;  %v150_v17 = vld [vmem:[#allocation11 + $0x10] sm:$0xff]  ;;  %v151_v50 = vld [vmem:[#allocation11 + $0x18] sm:$0xff]  ;;  %v160_v4 = vld [vmem:[#allocation11 + $0x60] sm:$0xff] }
  0xc3   :  { %v2378_v48 = vadd.f32 %v295_v38, %v3354_v8  ;;  %v358_v5 = vsel %vm2292_vm12, %v2303_v26, %v352_v55  ;;  %v361_v27 = vmul.f32 0.6931472, %v1433_v32  ;;  %v2384_v63 = vmul.f32 %v2201_v18, %v399_v30  ;;  %v152_v38 = vld [vmem:[#allocation11 + $0x20] sm:$0xff]  ;;  %v133_v30 = vld [vmem:[#allocation2 + $0x8] sm:$0xff]  ;;  %v134_v32 = vld [vmem:[#allocation2 + $0x10] sm:$0xff] }
  0xc4   :  { %v2374_v53 = vadd.f32 %v286_v31, %v3352_v16  ;;  %v3356_v57 = vmax.f32 %v2069_v14, 0.0  ;;  %v3357_v9 = vsel %vm2192_vm6, %v2204_v11, %v2253_v37  ;;  %v1435_v31 = vpop.eup %1434  ;;  %v2397_v26 = vadd.f32 %v313_v44, %v3359_v43  ;;  %v161_v43 = vld [vmem:[#allocation11 + $0x68] sm:$0xff] }
  0xc5   :  { %3355 = vst [vmem:[#allocation30_spill] sm:$0xff] %v2378_v48  ;;  %v3361_v18 = vmax.f32 %v2076_v20, 0.0  ;;  %v3363_v14 = vmax.f32 %v2080_v24, 0.0  ;;  %v3365_v11 = vmax.f32 %v2085_v28, 0.0  ;;  %v367_v15 = vsel %vm2309_vm13, %v364_v60, %v361_v27  ;;  %v159_v28 = vld [vmem:[#allocation11 + $0x58] sm:$0xff]  ;;  %v137_v27 = vld [vmem:[#allocation2 + $0x28] sm:$0xff] }
  0xc6   :  { %3353 = vst [vmem:[#allocation29_spill] sm:$0xff] %v2374_v53  ;;  %v2393_v13 = vadd.f32 %v3357_v9, %v3356_v57  ;;  %3360 = vst [vmem:[#allocation32_spill] sm:$0xff] %v2397_v26  ;;  %v370_v44 = vmul.f32 0.6931472, %v1435_v31  ;;  %v3367_v35 = vmax.f32 %v2087_v29, 0.0  ;;  %v420_v1 = vmul.f32 %v2354_v49, %v148_v56 }
  0xc7   :  { %v2401_v7 = vadd.f32 %v322_v54, %v3361_v18  ;;  %v2405_v2 = vadd.f32 %v331_v42, %v3363_v14  ;;  %v2409_v37 = vadd.f32 %v340_v45, %v3365_v11  ;;  %v3369_v54 = vmax.f32 %v2092_v33, 0.0  ;;  %v157_v42 = vld [vmem:[#allocation11 + $0x48] sm:$0xff]  ;;  %v1437_v29 = vpop.eup %1436 }
  0xc8   :  { %3358 = vst [vmem:[#allocation31_spill] sm:$0xff] %v2393_v13  ;;  %v2415_v20 = vadd.f32 %v349_v10, %v3367_v35  ;;  %v3371_v45 = vmax.f32 %v2094_v34, 0.0  ;;  %v421_v25 = vmul.f32 %v2363_v52, %v149_v0  ;;  %v422_v60 = vmul.f32 %v2374_v53, %v150_v17  ;;  %v132_v10 = vld [vmem:[#allocation2] sm:$0xff] }
  0xc9   :  { %3362 = vst [vmem:[#allocation33_spill] sm:$0xff] %v2401_v7  ;;  %3364 = vst [vmem:[#allocation34_spill] sm:$0xff] %v2405_v2  ;;  %v2419_v24 = vadd.f32 %v358_v5, %v3369_v54  ;;  %v376_v33 = vsel %vm2324_vm14, %v2320_v62, %v370_v44  ;;  %v423_v23 = vmul.f32 %v2378_v48, %v151_v50  ;;  %v379_v16 = vmul.f32 0.6931472, %v1437_v29  ;;  %v1439_v5 = vpop.eup %1438  ;;  %v136_v62 = vld [vmem:[#allocation2 + $0x20] sm:$0xff]  ;;  %v2452_v29 = vld [vmem:[#allocation11 + $0x70] sm:$0xff] }
  0xca   :  { %3366 = vst [vmem:[#allocation35_spill] sm:$0xff] %v2409_v37  ;;  %3368 = vst [vmem:[#allocation36_spill] sm:$0xff] %v2415_v20  ;;  %v2423_v3 = vadd.f32 %v367_v15, %v3371_v45  ;;  %v424_v55 = vmul.f32 %v2393_v13, %v152_v38  ;;  %v425_v34 = vmul.f32 %v2397_v26, %v153_v61  ;;  %v3373_v8 = vmax.f32 %v2103_v39, 0.0  ;;  %v1441_v38 = vpop.eup %1440  ;;  %v138_v39 = vld [vmem:[#allocation2 + $0x30] sm:$0xff]  ;;  %v139_v61 = vld [vmem:[#allocation2 + $0x38] sm:$0xff] }
  0xcb   :  { %3370 = vst [vmem:[#allocation37_spill] sm:$0xff] %v2419_v24  ;;  %v426_v0 = vmul.f32 %v2401_v7, %v154_v58  ;;  %v427_v17 = vmul.f32 %v2405_v2, %v155_v46  ;;  %v428_v57 = vmul.f32 %v2409_v37, %v156_v40  ;;  %v429_v9 = vmul.f32 %v2415_v20, %v157_v42  ;;  %v140_v46 = vld [vmem:[#allocation2 + $0x40] sm:$0xff]  ;;  %v141_v40 = vld [vmem:[#allocation2 + $0x48] sm:$0xff]  ;;  %v142_v15 = vld [vmem:[#allocation2 + $0x50] sm:$0xff] }
  0xcc   :  { %3372 = vst [vmem:[#allocation38_spill] sm:$0xff] %v2423_v3  ;;  %v2436_v56 = vadd.f32 %v376_v33, %v3373_v8  ;;  %v430_v31 = vmul.f32 %v2419_v24, %v158_v41  ;;  %v431_v50 = vmul.f32 %v2423_v3, %v159_v28  ;;  %v385_v18 = vsel %vm2334_vm15, %v2340_v19, %v379_v16  ;;  %v143_v28 = vld [vmem:[#allocation2 + $0x58] sm:$0xff]  ;;  %v144_v45 = vld [vmem:[#allocation2 + $0x60] sm:$0xff] }
  0xcd   :  { %v388_v14 = vmul.f32 0.6931472, %v1439_v5  ;;  %v436_v58 = vadd.f32 %v420_v1, %v132_v10  ;;  %v397_v44 = vmul.f32 0.6931472, %v1441_v38  ;;  %v3375_v35 = vmax.f32 %v2107_v47, 0.0  ;;  %v2457_v33 = vld [vmem:[#allocation11 + $0x78] sm:$0xff] }
  0xce   :  { %3374 = vst [vmem:[#allocation39_spill] sm:$0xff] %v2436_v56  ;;  %v432_v11 = vmul.f32 %v2436_v56, %v160_v4  ;;  %v437_v42 = vadd.f32 %v421_v25, %v133_v30  ;;  %v438_v41 = vadd.f32 %v422_v60, %v134_v32  ;;  %v439_v19 = vadd.f32 %v423_v23, %v135_v36  ;;  %v145_v4 = vld [vmem:[#allocation2 + $0x68] sm:$0xff]  ;;  %v2537_v56 = vld [vmem:[#allocation9 + $0x78] sm:$0xff] }
  0xcf   :  { %v2450_v54 = vadd.f32 %v385_v18, %v3375_v35  ;;  %v394_v12 = vsel %vm2343_vm0, %v2366_v22, %v388_v14  ;;  %v440_v1 = vadd.f32 %v424_v55, %v136_v62  ;;  %v441_v10 = vadd.f32 %v425_v34, %v137_v27  ;;  %1221 = vst [vmem:[#allocation14] sm:$0xff] %v436_v58 }
  0xd0   :  { %v403_v47 = vsel %vm2368_vm4, %v2384_v63, %v397_v44  ;;  %v3377_v25 = vmax.f32 %v2111_v51, 0.0  ;;  %v442_v32 = vadd.f32 %v426_v0, %v138_v39  ;;  %1222 = vst [vmem:[#allocation14 + $0x8] sm:$0xff] %v437_v42  ;;  %1223 = vst [vmem:[#allocation14 + $0x10] sm:$0xff] %v438_v41  ;;  %v3379_v22 = vmax.f32 %v2115_v59, 0.0 }
  0xd1   :  { %3376 = vst [vmem:[#allocation40_spill] sm:$0xff] %v2450_v54  ;;  %v433_v30 = vmul.f32 %v2450_v54, %v161_v43  ;;  %v443_v55 = vadd.f32 %v427_v17, %v139_v61  ;;  %v444_v34 = vadd.f32 %v428_v57, %v140_v46  ;;  %v445_v16 = vadd.f32 %v429_v9, %v141_v40 }
  0xd2   :  { %v2464_v60 = vadd.f32 %v394_v12, %v3377_v25  ;;  %v2469_v23 = vadd.f32 %v403_v47, %v3379_v22  ;;  %1224 = vst [vmem:[#allocation14 + $0x18] sm:$0xff] %v439_v19  ;;  %1225 = vst [vmem:[#allocation14 + $0x20] sm:$0xff] %v440_v1  ;;  %v446_v63 = vadd.f32 %v430_v31, %v142_v15 }
  0xd3   :  { %1226 = vst [vmem:[#allocation14 + $0x28] sm:$0xff] %v441_v10  ;;  %v447_v8 = vadd.f32 %v431_v50, %v143_v28  ;;  %v448_v0 = vadd.f32 %v432_v11, %v144_v45  ;;  %1227 = vst [vmem:[#allocation14 + $0x30] sm:$0xff] %v442_v32  ;;  %v449_v59 = vadd.f32 %v433_v30, %v145_v4 }
  0xd4   :  { %3378 = vst [vmem:[#allocation41_spill] sm:$0xff] %v2464_v60  ;;  %3380 = vst [vmem:[#allocation42_spill] sm:$0xff] %v2469_v23  ;;  %v434_v51 = vmul.f32 %v2464_v60, %v2452_v29  ;;  %v435_v5 = vmul.f32 %v2469_v23, %v2457_v33  ;;  %v556_v36 = vmul.f32 %v436_v58, %v436_v58 }
  0xd5   :  { %1228 = vst [vmem:[#allocation14 + $0x38] sm:$0xff] %v443_v55  ;;  %1229 = vst [vmem:[#allocation14 + $0x40] sm:$0xff] %v444_v34  ;;  %v557_v62 = vmul.f32 %v437_v42, %v437_v42  ;;  %v558_v57 = vmul.f32 %v438_v41, %v438_v41  ;;  %v559_v9 = vmul.f32 %v439_v19, %v439_v19 }
  0xd6   :  { %1230 = vst [vmem:[#allocation14 + $0x48] sm:$0xff] %v445_v16  ;;  %v450_v17 = vadd.f32 %v434_v51, %v146_v21  ;;  %1231 = vst [vmem:[#allocation14 + $0x50] sm:$0xff] %v446_v63  ;;  %v451_v27 = vadd.f32 %v435_v5, %v147_v6  ;;  %v572_v31 = vsub.f32 0.0, %v556_v36  ;;  %v560_v38 = vmul.f32 %v440_v1, %v440_v1  ;;  %v2475_v5 = vld [vmem:[#allocation9] sm:$0xff] }
  0xd7   :  { %1232 = vst [vmem:[#allocation14 + $0x58] sm:$0xff] %v447_v8  ;;  %1233 = vst [vmem:[#allocation14 + $0x60] sm:$0xff] %v448_v0  ;;  %v573_v50 = vsub.f32 0.0, %v557_v62  ;;  %v561_v39 = vmul.f32 %v441_v10, %v441_v10  ;;  %v574_v61 = vsub.f32 0.0, %v558_v57  ;;  %v562_v43 = vmul.f32 %v442_v32, %v442_v32 }
  0xd8   :  { %1234 = vst [vmem:[#allocation14 + $0x68] sm:$0xff] %v449_v59  ;;  %1235 = vst [vmem:[#allocation14 + $0x70] sm:$0xff] %v450_v17  ;;  %v563_v18 = vmul.f32 %v443_v55, %v443_v55  ;;  %v564_v14 = vmul.f32 %v444_v34, %v444_v34  ;;  %v565_v11 = vmul.f32 %v445_v16, %v445_v16  ;;  %v575_v46 = vsub.f32 0.0, %v559_v9  ;;  %v2483_v9 = vld [vmem:[#allocation9 + $0x18] sm:$0xff] }
  0xd9   :  { %1236 = vst [vmem:[#allocation14 + $0x78] sm:$0xff] %v451_v27  ;;  %v566_v58 = vmul.f32 %v446_v63, %v446_v63  ;;  %v588_v40 = vmul.f32 0.5, %v572_v31  ;;  %v589_v15 = vmul.f32 0.5, %v573_v50  ;;  %v567_v44 = vmul.f32 %v447_v8, %v447_v8  ;;  %v2485_v31 = vld [vmem:[#allocation9 + $0x20] sm:$0xff]  ;;  %v2487_v50 = vld [vmem:[#allocation9 + $0x28] sm:$0xff] }
  0xda   :  { %v568_v35 = vmul.f32 %v448_v0, %v448_v0  ;;  %v569_v42 = vmul.f32 %v449_v59, %v449_v59  ;;  %v570_v41 = vmul.f32 %v450_v17, %v450_v17  ;;  %v571_v28 = vmul.f32 %v451_v27, %v451_v27  ;;  %v2477_v59 = vld [vmem:[#allocation9 + $0x8] sm:$0xff]  ;;  %v2479_v17 = vld [vmem:[#allocation9 + $0x10] sm:$0xff] }
  0xdb   :  { %v576_v45 = vsub.f32 0.0, %v560_v38  ;;  %v590_v12 = vmul.f32 0.5, %v574_v61  ;;  %v577_v19 = vsub.f32 0.0, %v561_v39  ;;  %v578_v4 = vsub.f32 0.0, %v562_v43 }
  0xdc   :  { %v579_v1 = vsub.f32 0.0, %v563_v18  ;;  %v580_v10 = vsub.f32 0.0, %v564_v14  ;;  %v581_v47 = vsub.f32 0.0, %v565_v11  ;;  %v582_v25 = vsub.f32 0.0, %v566_v58  ;;  %v2497_v18 = vld [vmem:[#allocation9 + $0x30] sm:$0xff]  ;;  %v2499_v14 = vld [vmem:[#allocation9 + $0x38] sm:$0xff] }
  0xdd   :  { %v591_v30 = vmul.f32 0.5, %v575_v46  ;;  %v604_v32 = vadd.f32 %v589_v15, %v588_v40  ;;  %v583_v21 = vsub.f32 0.0, %v567_v44  ;;  %v584_v22 = vsub.f32 0.0, %v568_v35  ;;  %v2503_v46 = vld [vmem:[#allocation9 + $0x40] sm:$0xff]  ;;  %v2505_v40 = vld [vmem:[#allocation9 + $0x48] sm:$0xff]  ;;  %v2509_v35 = vld [vmem:[#allocation9 + $0x50] sm:$0xff] }
  0xde   :  { %v585_v55 = vsub.f32 0.0, %v569_v42  ;;  %v586_v34 = vsub.f32 0.0, %v570_v41  ;;  %v587_v16 = vsub.f32 0.0, %v571_v28  ;;  %v592_v6 = vmul.f32 0.5, %v576_v45 }
  0xdf   :  { %v605_v51 = vadd.f32 %v604_v32, %v590_v12  ;;  %v593_v63 = vmul.f32 0.5, %v577_v19  ;;  %v594_v8 = vmul.f32 0.5, %v578_v4  ;;  %v595_v0 = vmul.f32 0.5, %v579_v1  ;;  %v2514_v12 = vld [vmem:[#allocation9 + $0x58] sm:$0xff]  ;;  %v2516_v19 = vld [vmem:[#allocation9 + $0x60] sm:$0xff] }
  0xe0   :  { %v596_v36 = vmul.f32 0.5, %v580_v10  ;;  %v597_v62 = vmul.f32 0.5, %v581_v47  ;;  %v2481_v27 = vmul.f32 0.5, %v582_v25  ;;  %v2489_v38 = vmul.f32 0.5, %v583_v21 }
  0xe1   :  { %v606_v57 = vadd.f32 %v605_v51, %v591_v30  ;;  %v2491_v39 = vmul.f32 0.5, %v584_v22  ;;  %v2493_v61 = vmul.f32 0.5, %v585_v55  ;;  %v2495_v43 = vmul.f32 0.5, %v586_v34  ;;  %v2525_v22 = vld [vmem:[#allocation9 + $0x68] sm:$0xff] }
  0xe2   :  { %v2501_v11 = vmul.f32 0.5, %v587_v16  ;;  %v741_v44 = vand.u32 2147483647, %v2475_v5  ;;  %v742_v42 = vand.u32 2147483647, %v2477_v59 }
  0xe3   :  { %v607_v58 = vadd.f32 %v606_v57, %v592_v6  ;;  %v743_v41 = vand.u32 2147483647, %v2479_v17  ;;  %v744_v28 = vand.u32 2147483647, %v2483_v9  ;;  %v745_v10 = vand.u32 2147483647, %v2485_v31 }
  0xe4   :  { %v746_v30 = vand.u32 2147483647, %v2487_v50  ;;  %v747_v32 = vand.u32 2147483647, %v2497_v18  ;;  %v748_v55 = vand.u32 2147483647, %v2499_v14 }
  0xe5   :  { %v608_v45 = vadd.f32 %v607_v58, %v593_v63  ;;  %v749_v34 = vand.u32 2147483647, %v2503_v46  ;;  %v757_v16 = vsub.f32 0.0, %v741_v44  ;;  %v750_v6 = vand.u32 2147483647, %v2505_v40  ;;  %v2535_v44 = vld [vmem:[#allocation9 + $0x70] sm:$0xff] }
  0xe6   :  { %v758_v51 = vsub.f32 0.0, %v742_v42  ;;  %v759_v63 = vsub.f32 0.0, %v743_v41  ;;  %v760_v57 = vsub.f32 0.0, %v744_v28  ;;  %v751_v25 = vand.u32 2147483647, %v2509_v35 }
  0xe7   :  { %v609_v21 = vadd.f32 %v608_v45, %v594_v8  ;;  %v752_v47 = vand.u32 2147483647, %v2514_v12  ;;  %v761_v1 = vsub.f32 0.0, %v745_v10  ;;  %v753_v45 = vand.u32 2147483647, %v2516_v19 }
  0xe8   :  { %v754_v4 = vand.u32 2147483647, %v2525_v22  ;;  %v762_v15 = vsub.f32 0.0, %v746_v30  ;;  %v763_v60 = vsub.f32 0.0, %v747_v32  ;;  %v764_v42 = vsub.f32 0.0, %v748_v55 }
  0xe9   :  { %v610_v58 = vadd.f32 %v609_v21, %v595_v0  ;;  %v773_v41 = vmul.f32 1.442695, %v757_v16  ;;  %v775_v28 = vmul.f32 1.442695, %v758_v51  ;;  %v777_v0 = vmul.f32 1.442695, %v759_v63 }
  0xea   :  { %v779_v21 = vmul.f32 1.442695, %v760_v57  ;;  %v765_v10 = vsub.f32 0.0, %v749_v34  ;;  %v781_v8 = vmul.f32 1.442695, %v761_v1  ;;  %v766_v24 = vsub.f32 0.0, %v750_v6 }
  0xeb   :  { %v611_v23 = vadd.f32 %v610_v58, %v596_v36  ;;  %1442 = vpow2.f32 %v773_v41  ;;  %v755_v3 = vand.u32 2147483647, %v2535_v44  ;;  %v783_v30 = vmul.f32 1.442695, %v762_v15 }
  0xec   :  { %1444 = vpow2.f32 %v775_v28  ;;  %v767_v58 = vsub.f32 0.0, %v751_v25  ;;  %v785_v32 = vmul.f32 1.442695, %v763_v60  ;;  %v756_v55 = vand.u32 2147483647, %v2537_v56 }
  0xed   :  { %v612_v54 = vadd.f32 %v611_v23, %v597_v62  ;;  %1446 = vpow2.f32 %v777_v0  ;;  %v768_v16 = vsub.f32 0.0, %v752_v47  ;;  %v787_v23 = vmul.f32 1.442695, %v764_v42 }
  0xee   :  { %1448 = vpow2.f32 %v779_v21  ;;  %v769_v34 = vsub.f32 0.0, %v753_v45  ;;  %v789_v1 = vmul.f32 1.442695, %v765_v10  ;;  %v770_v6 = vsub.f32 0.0, %v754_v4 }
  0xef   :  { %v613_v36 = vadd.f32 %v612_v54, %v2481_v27  ;;  %1450 = vpow2.f32 %v781_v8  ;;  %v791_v15 = vmul.f32 1.442695, %v766_v24  ;;  %v771_v27 = vsub.f32 0.0, %v755_v3 }
  0xf0   :  { %1452 = vpow2.f32 %v783_v30  ;;  %v793_v60 = vmul.f32 1.442695, %v767_v58  ;;  %v772_v47 = vsub.f32 0.0, %v756_v55  ;;  %v795_v63 = vmul.f32 1.442695, %v768_v16 }
  0xf1   :  { %v614_v62 = vadd.f32 %v613_v36, %v2489_v38  ;;  %1454 = vpow2.f32 %v785_v32  ;;  %v797_v8 = vmul.f32 1.442695, %v769_v34  ;;  %v801_v41 = vmul.f32 1.442695, %v771_v27 }
  0xf2   :  { %1456 = vpow2.f32 %v787_v23  ;;  %v803_v0 = vmul.f32 1.442695, %v772_v47 }
  0xf3   :  { %v615_v54 = vadd.f32 %v614_v62, %v2491_v39  ;;  %1458 = vpow2.f32 %v789_v1  ;;  %v799_v39 = vmul.f32 1.442695, %v770_v6 }
  0xf4   :  { %1460 = vpow2.f32 %v791_v15 }
  0xf5   :  { %v616_v38 = vadd.f32 %v615_v54, %v2493_v61  ;;  %v1443_v3 = vpop.eup %1442  ;;  %1462 = vpow2.f32 %v793_v60 }
  0xf6   :  { %v1445_v28 = vpop.eup %1444  ;;  %1464 = vpow2.f32 %v795_v63  ;;  %v808_v21 = vmul.f32 -0.5, %v1443_v3  ;;  %v805_v36 = vadd.f32 1.0, %v1443_v3 }
  0xf7   :  { %v617_v45 = vadd.f32 %v616_v38, %v2495_v43  ;;  %v1447_v10 = vpop.eup %1446  ;;  %1466 = vpow2.f32 %v797_v8  ;;  %v817_v58 = vmul.f32 -0.5, %v1445_v28  ;;  %v811_v43 = vand.u32 2147483647, %v1443_v3 }
  0xf8   :  { %v1449_v32 = vpop.eup %1448  ;;  %1468 = vpow2.f32 %v799_v39  ;;  %v814_v16 = vadd.f32 1.0, %v1445_v28  ;;  %v809_v62 = vadd.f32 1.0, %v808_v21  ;;  %v823_v34 = vadd.f32 1.0, %v1447_v10 }
  0xf9   :  { %v618_v30 = vadd.f32 %v617_v45, %v2501_v11  ;;  %v1451_v23 = vpop.eup %1450  ;;  %1470 = vpow2.f32 %v801_v41  ;;  %v826_v1 = vmul.f32 -0.5, %v1447_v10  ;;  %v818_v54 = vadd.f32 1.0, %v817_v58 }
  0xfa   :  { %v1453_v6 = vpop.eup %1452  ;;  %1472 = vpow2.f32 %v803_v0  ;;  %v820_v60 = vand.u32 2147483647, %v1445_v28  ;;  %v829_v47 = vand.u32 2147483647, %v1447_v10  ;;  %v832_v63 = vadd.f32 1.0, %v1449_v32 }
  0xfb   :  { %619 = vadd.xlane.f32.xlu0 %v618_v30  ;;  %v2557_v27 = vpop.eup %1454  ;;  %1474 = vlog2.f32 %v805_v36  ;;  %v827_v8 = vadd.f32 1.0, %v826_v1  ;;  %v835_v39 = vmul.f32 -0.5, %v1449_v32  ;;  %v838_v45 = vand.u32 2147483647, %v1449_v32  ;;  %v692_v30 = vld [vmem:[#allocation8 + $0x78] sm:$0xff] }
  0xfc   :  { %v2559_v38 = vpop.eup %1456  ;;  %1476 = vlog2.f32 %v814_v16  ;;  %v2563_v21 = vmul.f32 %v1443_v3, %v809_v62  ;;  %vm2565_vm2 = vcmp.lt.f32.partialorder %v811_v43, 0.0004427343  ;;  %v841_v0 = vadd.f32 1.0, %v1451_v23 }
  0xfd   :  { %v2561_v41 = vpop.eup %1458  ;;  %1478 = vlog2.f32 %v823_v34  ;;  %v844_v36 = vmul.f32 -0.5, %v1451_v23  ;;  %v2571_v11 = vmul.f32 %v1445_v28, %v818_v54  ;;  %v836_v16 = vadd.f32 1.0, %v835_v39  ;;  %v2809_v28 = vld [vmem:[#allocation12 + $0x10] sm:$0xff] }
  0xfe   :  { %v2569_v58 = vpop.eup %1460  ;;  %1480 = vlog2.f32 %v832_v63  ;;  %v847_v1 = vand.u32 2147483647, %v1451_v23  ;;  %vm2575_vm3 = vcmp.lt.f32.partialorder %v820_v60, 0.0004427343  ;;  %v850_v43 = vadd.f32 1.0, %v1453_v6 }
  0xff   :  { %v2573_v15 = vpop.eup %1462  ;;  %1482 = vlog2.f32 %v841_v0  ;;  %v845_v3 = vadd.f32 1.0, %v844_v36  ;;  %v853_v62 = vmul.f32 -0.5, %v1453_v6  ;;  %v2581_v61 = vmul.f32 %v1447_v10, %v827_v8 }
 0x100   :  { %v2579_v34 = vpop.eup %1464  ;;  %vm2583_vm5 = vcmp.lt.f32.partialorder %v829_v47, 0.0004427343  ;;  %vm2587_vm6 = vcmp.lt.f32.partialorder %v838_v45, 0.0004427343  ;;  %v856_v60 = vand.u32 2147483647, %v1453_v6  ;;  %v2594_v0 = vmul.f32 %v1449_v32, %v836_v16 }
 0x101   :  { %v859_v63 = vadd.f32 1.0, %v2557_v27  ;;  %v2592_v39 = vpop.eup %1466  ;;  %1484 = vlog2.f32 %v850_v43  ;;  %v854_v36 = vadd.f32 1.0, %v853_v62  ;;  %v862_v10 = vmul.f32 -0.5, %v2557_v27 }
 0x102   :  { %v2597_v8 = vpop.eup %1468  ;;  %vm2599_vm7 = vcmp.lt.f32.partialorder %v847_v1, 0.0004427343  ;;  %v865_v45 = vand.u32 2147483647, %v2557_v27  ;;  %v868_v42 = vadd.f32 1.0, %v2559_v38  ;;  %v2607_v4 = vmul.f32 %v1451_v23, %v845_v3 }
 0x103   :  { %1486 = vlog2.f32 %v859_v63  ;;  %v2605_v24 = vpop.eup %1470  ;;  %v863_v32 = vadd.f32 1.0, %v862_v10  ;;  %v871_v16 = vmul.f32 -0.5, %v2559_v38  ;;  %v874_v43 = vand.u32 2147483647, %v2559_v38 }
 0x104   :  { %v2611_v62 = vpop.eup %1472  ;;  %vm2613_vm8 = vcmp.lt.f32.partialorder %v856_v60, 0.0004427343  ;;  %1488 = vlog2.f32 %v868_v42  ;;  %v877_v63 = vadd.f32 1.0, %v2561_v41  ;;  %v880_v57 = vmul.f32 -0.5, %v2561_v41 }
 0x105   :  { %v1475_v25 = vpop.eup %1474  ;;  %v2619_v51 = vmul.f32 %v1453_v6, %v854_v36  ;;  %vm2621_vm9 = vcmp.lt.f32.partialorder %v865_v45, 0.0004427343  ;;  %v872_v3 = vadd.f32 1.0, %v871_v16  ;;  %v883_v10 = vand.u32 2147483647, %v2561_v41 }
 0x106   :  { %v1477_v20 = vpop.eup %1476  ;;  %v2626_v60 = vmul.f32 0.6931472, %v1475_v25  ;;  %1490 = vlog2.f32 %v877_v63  ;;  %v881_v37 = vadd.f32 1.0, %v880_v57  ;;  %v886_v42 = vadd.f32 1.0, %v2569_v58 }
 0x107   :  { %v1479_v2 = vpop.eup %1478  ;;  %v2629_v7 = vmul.f32 0.6931472, %v1477_v20  ;;  %v2632_v6 = vmul.f32 %v2557_v27, %v863_v32  ;;  %vm2634_vm10 = vcmp.lt.f32.partialorder %v874_v43, 0.0004427343  ;;  %v889_v45 = vmul.f32 -0.5, %v2569_v58 }
 0x108   :  { %v1481_v16 = vpop.eup %1480  ;;  %v2643_v57 = vmul.f32 0.6931472, %v1479_v2  ;;  %v2646_v20 = vmul.f32 %v2559_v38, %v872_v3  ;;  %1492 = vlog2.f32 %v886_v42  ;;  %v2651_v43 = vmul.f32 %v2561_v41, %v881_v37 }
 0x109   :  { %v1483_v27 = vpop.eup %1482  ;;  %v2648_v32 = vmul.f32 0.6931472, %v1481_v16  ;;  %vm2653_vm11 = vcmp.lt.f32.partialorder %v883_v10, 0.0004427343  ;;  %v890_v26 = vadd.f32 1.0, %v889_v45  ;;  %v895_v3 = vadd.f32 1.0, %v2573_v15 }
 0x10a   :  { %v892_v13 = vand.u32 2147483647, %v2569_v58  ;;  %v2662_v38 = vmul.f32 0.6931472, %v1483_v27  ;;  %v898_v42 = vmul.f32 -0.5, %v2573_v15  ;;  %v916_v1 = vmul.f32 -0.5, %v2592_v39 }
 0x10b   :  { %v1485_v37 = vpop.eup %1484  ;;  %v2675_v45 = vmul.f32 %v2569_v58, %v890_v26  ;;  %v901_v16 = vand.u32 2147483647, %v2573_v15  ;;  %1494 = vlog2.f32 %v895_v3  ;;  %v904_v26 = vadd.f32 1.0, %v2579_v34 }
 0x10c   :  { %v2678_v2 = vmul.f32 0.6931472, %v1485_v37  ;;  %vm2680_vm12 = vcmp.lt.f32.partialorder %v892_v13, 0.0004427343  ;;  %v899_v48 = vadd.f32 1.0, %v898_v42  ;;  %v849_v41 = vsel %vm2599_vm7, %v2607_v4, %v2662_v38 }
 0x10d   :  { %v1487_v27 = vpop.eup %1486  ;;  %v907_v58 = vmul.f32 -0.5, %v2579_v34  ;;  %vm2696_vm13 = vcmp.lt.f32.partialorder %v901_v16, 0.0004427343  ;;  %v910_v42 = vand.u32 2147483647, %v2579_v34  ;;  %v913_v4 = vadd.f32 1.0, %v2592_v39 }
 0x10e   :  { %v2688_v10 = vmul.f32 0.6931472, %v1487_v27  ;;  %v1489_v53 = vpop.eup %1488  ;;  %v858_v13 = vsel %vm2613_vm8, %v2619_v51, %v2678_v2  ;;  %v2705_v38 = vmul.f32 %v2573_v15, %v899_v48  ;;  %1496 = vlog2.f32 %v904_v26 }
 0x10f   :  { %v2702_v47 = vmul.f32 0.6931472, %v1489_v53  ;;  %v908_v37 = vadd.f32 1.0, %v907_v58  ;;  %1498 = vlog2.f32 %v913_v4  ;;  %v919_v2 = vand.u32 2147483647, %v2592_v39 }
 0x110   :  { %v1491_v27 = vpop.eup %1490  ;;  %v867_v51 = vsel %vm2621_vm9, %v2632_v6, %v2688_v10  ;;  %vm2717_vm14 = vcmp.lt.f32.partialorder %v910_v42, 0.0004427343  ;;  %v922_v16 = vadd.f32 1.0, %v2597_v8  ;;  %v917_v6 = vadd.f32 1.0, %v916_v1 }
 0x111   :  { %v876_v53 = vsel %vm2634_vm10, %v2646_v20, %v2702_v47  ;;  %v879_v48 = vmul.f32 0.6931472, %v1491_v27  ;;  %v2723_v23 = vmul.f32 %v2579_v34, %v908_v37  ;;  %v925_v10 = vmul.f32 -0.5, %v2597_v8 }
 0x112   :  { %v1493_v26 = vpop.eup %1492  ;;  %v928_v58 = vand.u32 2147483647, %v2597_v8  ;;  %vm2727_vm15 = vcmp.lt.f32.partialorder %v919_v2, 0.0004427343  ;;  %1500 = vlog2.f32 %v922_v16  ;;  %v931_v20 = vadd.f32 1.0, %v2605_v24 }
 0x113   :  { %v888_v4 = vmul.f32 0.6931472, %v1493_v26  ;;  %v885_v42 = vsel %vm2653_vm11, %v2651_v43, %v879_v48  ;;  %v918_v34 = vmul.f32 %v2592_v39, %v917_v6  ;;  %v926_v47 = vadd.f32 1.0, %v925_v10  ;;  %v2917_v10 = vld [vmem:[#allocation12 + $0x78] sm:$0xff] }
 0x114   :  { %v934_v37 = vmul.f32 -0.5, %v2605_v24  ;;  %vm2737_vm0 = vcmp.lt.f32.partialorder %v928_v58, 0.0004427343  ;;  %1502 = vlog2.f32 %v931_v20  ;;  %v937_v1 = vand.u32 2147483647, %v2605_v24 }
 0x115   :  { %v940_v2 = vadd.f32 1.0, %v2611_v62  ;;  %v1495_v16 = vpop.eup %1494  ;;  %v894_v63 = vsel %vm2680_vm12, %v2675_v45, %v888_v4  ;;  %v943_v39 = vmul.f32 -0.5, %v2611_v62  ;;  %v946_v48 = vand.u32 2147483647, %v2611_v62 }
 0x116   :  { %v935_v43 = vadd.f32 1.0, %v934_v37  ;;  %v897_v26 = vmul.f32 0.6931472, %v1495_v16  ;;  %v2749_v6 = vmul.f32 %v2597_v8, %v926_v47  ;;  %vm2751_vm4 = vcmp.lt.f32.partialorder %v937_v1, 0.0004427343  ;;  %v2776_v1 = vld [vmem:[#allocation12] sm:$0xff] }
 0x117   :  { %1504 = vlog2.f32 %v940_v2  ;;  %v944_v20 = vadd.f32 1.0, %v943_v39  ;;  %v3411_v25 = vmax.f32 %v2475_v5, 0.0  ;;  %v3412_v45 = vsel %vm2565_vm2, %v2563_v21, %v2626_v60  ;;  %v2778_v5 = vld [vmem:[#allocation12 + $0x8] sm:$0xff]  ;;  %v2811_v16 = vld [vmem:[#allocation12 + $0x18] sm:$0xff] }
 0x118   :  { %v2756_v58 = vmul.f32 %v2605_v24, %v935_v43  ;;  %v3413_v8 = vmax.f32 %v2477_v59, 0.0  ;;  %v3414_v47 = vsel %vm2575_vm3, %v2571_v11, %v2629_v7  ;;  %v1497_v24 = vpop.eup %1496  ;;  %v903_v21 = vsel %vm2696_vm13, %v2705_v38, %v897_v26  ;;  %v2828_v43 = vld [vmem:[#allocation12 + $0x30] sm:$0xff] }
 0x119   :  { %v2765_v4 = vadd.f32 %v3412_v45, %v3411_v25  ;;  %vm2783_vm2 = vcmp.lt.f32.partialorder %v946_v48, 0.0004427343  ;;  %v3418_v59 = vmax.f32 %v2479_v17, 0.0  ;;  %v3419_v7 = vsel %vm2583_vm5, %v2581_v61, %v2643_v57  ;;  %v1499_v17 = vpop.eup %1498  ;;  %v2846_v25 = vld [vmem:[#allocation12 + $0x48] sm:$0xff] }
 0x11a   :  { %v2774_v37 = vadd.f32 %v3414_v47, %v3413_v8  ;;  %v3421_v11 = vmax.f32 %v2483_v9, 0.0  ;;  %v3422_v60 = vsel %vm2587_vm6, %v2594_v0, %v2648_v32  ;;  %v3424_v38 = vmax.f32 %v2485_v31, 0.0  ;;  %v2824_v31 = vld [vmem:[#allocation12 + $0x20] sm:$0xff]  ;;  %v2861_v8 = vld [vmem:[#allocation12 + $0x58] sm:$0xff] }
 0x11b   :  { %v2794_v55 = vadd.f32 %v3419_v7, %v3418_v59  ;;  %v906_v61 = vmul.f32 0.6931472, %v1497_v24  ;;  %v2814_v57 = vmul.f32 %v2611_v62, %v944_v20  ;;  %v3426_v9 = vmax.f32 %v2487_v50, 0.0  ;;  %v2844_v20 = vld [vmem:[#allocation12 + $0x40] sm:$0xff]  ;;  %3438 = vst [vmem:[#allocation53_spill] sm:$0xff] %v2861_v8  ;;  %v678_v59 = vld [vmem:[#allocation8 + $0x8] sm:$0xff] }
 0x11c   :  { %3415 = vst [vmem:[#allocation43_spill] sm:$0xff] %v2774_v37  ;;  %v2803_v3 = vadd.f32 %v3422_v60, %v3421_v11  ;;  %v2807_v2 = vadd.f32 %v849_v41, %v3424_v38  ;;  %v3428_v0 = vmax.f32 %v2497_v18, 0.0  ;;  %v2826_v41 = vld [vmem:[#allocation12 + $0x28] sm:$0xff]  ;;  %v915_v39 = vmul.f32 0.6931472, %v1499_v17  ;;  %v2873_v7 = vld [vmem:[#allocation12 + $0x60] sm:$0xff] }
 0x11d   :  { %3420 = vst [vmem:[#allocation44_spill] sm:$0xff] %v2794_v55  ;;  %v2818_v54 = vadd.f32 %v858_v13, %v3426_v9  ;;  %v3430_v48 = vmax.f32 %v2499_v14, 0.0  ;;  %v3432_v62 = vmax.f32 %v2503_v46, 0.0  ;;  %v3434_v13 = vmax.f32 %v2505_v40, 0.0  ;;  %v679_v17 = vld [vmem:[#allocation8 + $0x10] sm:$0xff] }
 0x11e   :  { %3423 = vst [vmem:[#allocation45_spill] sm:$0xff] %v2803_v3  ;;  %3425 = vst [vmem:[#allocation46_spill] sm:$0xff] %v2807_v2  ;;  %v2822_v32 = vadd.f32 %v867_v51, %v3428_v0  ;;  %v2842_v51 = vld [vmem:[#allocation12 + $0x38] sm:$0xff]  ;;  %v912_v14 = vsel %vm2717_vm14, %v2723_v23, %v906_v61  ;;  %v965_v46 = vmul.f32 %v2765_v4, %v2776_v1  ;;  %v3439_v15 = vmax.f32 %v2514_v12, 0.0 }
 0x11f   :  { %3427 = vst [vmem:[#allocation47_spill] sm:$0xff] %v2818_v54  ;;  %v2832_v26 = vadd.f32 %v876_v53, %v3430_v48  ;;  %v2836_v50 = vadd.f32 %v885_v42, %v3432_v62  ;;  %v2840_v18 = vadd.f32 %v894_v63, %v3434_v13  ;;  %v3436_v53 = vmax.f32 %v2509_v35, 0.0  ;;  %v1501_v42 = vpop.eup %1500  ;;  %v2859_v63 = vld [vmem:[#allocation12 + $0x50] sm:$0xff]  ;;  %v680_v61 = vld [vmem:[#allocation8 + $0x18] sm:$0xff]  ;;  %v681_v48 = vld [vmem:[#allocation8 + $0x20] sm:$0xff] }
 0x120   :  { %3429 = vst [vmem:[#allocation48_spill] sm:$0xff] %v2822_v32  ;;  %v966_v40 = vmul.f32 %v2774_v37, %v2778_v5  ;;  %v921_v47 = vsel %vm2727_vm15, %v918_v34, %v915_v39  ;;  %v2867_v23 = vadd.f32 %v912_v14, %v3439_v15  ;;  %v967_v35 = vmul.f32 %v2794_v55, %v2809_v28  ;;  %v1503_v34 = vpop.eup %1502  ;;  %v682_v62 = vld [vmem:[#allocation8 + $0x28] sm:$0xff]  ;;  %v688_v37 = vld [vmem:[#allocation8 + $0x58] sm:$0xff] }
 0x121   :  { %3431 = vst [vmem:[#allocation49_spill] sm:$0xff] %v2832_v26  ;;  %3433 = vst [vmem:[#allocation50_spill] sm:$0xff] %v2836_v50  ;;  %v2853_v45 = vadd.f32 %v903_v21, %v3436_v53  ;;  %v968_v24 = vmul.f32 %v2803_v3, %v2811_v16  ;;  %v677_v21 = vld [vmem:[#allocation8] sm:$0xff]  ;;  %v924_v11 = vmul.f32 0.6931472, %v1501_v42  ;;  %v3441_v60 = vmax.f32 %v2516_v19, 0.0  ;;  %v1505_v15 = vpop.eup %1504 }
 0x122   :  { %3435 = vst [vmem:[#allocation51_spill] sm:$0xff] %v2840_v18  ;;  %3440 = vst [vmem:[#allocation54_spill] sm:$0xff] %v2867_v23  ;;  %v969_v12 = vmul.f32 %v2807_v2, %v2824_v31  ;;  %v970_v36 = vmul.f32 %v2818_v54, %v2826_v41  ;;  %v971_v9 = vmul.f32 %v2822_v32, %v2828_v43  ;;  %v2891_v13 = vld [vmem:[#allocation12 + $0x68] sm:$0xff]  ;;  %v933_v53 = vmul.f32 0.6931472, %v1503_v34  ;;  %v687_v34 = vld [vmem:[#allocation8 + $0x50] sm:$0xff] }
 0x123   :  { %3437 = vst [vmem:[#allocation52_spill] sm:$0xff] %v2853_v45  ;;  %v2877_v38 = vadd.f32 %v921_v47, %v3441_v60  ;;  %v972_v0 = vmul.f32 %v2832_v26, %v2842_v51  ;;  %v973_v19 = vmul.f32 %v2836_v50, %v2844_v20  ;;  %v974_v39 = vmul.f32 %v2840_v18, %v2846_v25  ;;  %v683_v60 = vld [vmem:[#allocation8 + $0x30] sm:$0xff]  ;;  %v684_v50 = vld [vmem:[#allocation8 + $0x38] sm:$0xff]  ;;  %v685_v26 = vld [vmem:[#allocation8 + $0x40] sm:$0xff] }
 0x124   :  { %v930_v14 = vsel %vm2737_vm0, %v2749_v6, %v924_v11  ;;  %v975_v42 = vmul.f32 %v2853_v45, %v2859_v63  ;;  %v976_v47 = vmul.f32 %v2867_v23, %v2861_v8  ;;  %v3442_v18 = vmax.f32 %v2525_v22, 0.0  ;;  %v686_v11 = vld [vmem:[#allocation8 + $0x48] sm:$0xff]  ;;  %v2906_v2 = vld [vmem:[#allocation12 + $0x70] sm:$0xff]  ;;  %v689_v22 = vld [vmem:[#allocation8 + $0x60] sm:$0xff] }
 0x125   :  { %v977_v54 = vmul.f32 %v2877_v38, %v2873_v7  ;;  %v981_v27 = vadd.f32 %v965_v46, %v677_v21  ;;  %v982_v6 = vadd.f32 %v966_v40, %v678_v59  ;;  %v939_v23 = vsel %vm2751_vm4, %v2756_v58, %v933_v53  ;;  %v691_v59 = vld [vmem:[#allocation8 + $0x70] sm:$0xff] }
 0x126   :  { %v2902_v32 = vadd.f32 %v930_v14, %v3442_v18  ;;  %v942_v45 = vmul.f32 0.6931472, %v1505_v15  ;;  %v983_v3 = vadd.f32 %v967_v35, %v679_v17  ;;  %v984_v55 = vadd.f32 %v968_v24, %v680_v61  ;;  %v690_v18 = vld [vmem:[#allocation8 + $0x68] sm:$0xff]  ;;  %v1578_v15 = vld [vmem:[#allocation11 + $0x10] sm:$0xff] }
 0x127   :  { %v3443_v14 = vmax.f32 %v2535_v44, 0.0  ;;  %v985_v40 = vadd.f32 %v969_v12, %v681_v48  ;;  %v986_v21 = vadd.f32 %v970_v36, %v682_v62  ;;  %1238 = vst [vmem:[#allocation17] sm:$0xff] %v981_v27  ;;  %1239 = vst [vmem:[#allocation17 + $0x8] sm:$0xff] %v982_v6  ;;  %v2922_v35 = vadd.f32 %v971_v9, %v683_v60  ;;  %v1576_v62 = vld [vmem:[#allocation11] sm:$0xff] }
 0x128   :  { %v978_v46 = vmul.f32 %v2902_v32, %v2891_v13  ;;  %v948_v58 = vsel %vm2783_vm2, %v2814_v57, %v942_v45  ;;  %v2924_v24 = vadd.f32 %v972_v0, %v684_v50  ;;  %v2926_v44 = vadd.f32 %v973_v19, %v685_v26  ;;  %1240 = vst [vmem:[#allocation17 + $0x10] sm:$0xff] %v983_v3 }
 0x129   :  { %v2913_v8 = vadd.f32 %v939_v23, %v3443_v14  ;;  %1241 = vst [vmem:[#allocation17 + $0x18] sm:$0xff] %v984_v55  ;;  %v3444_v23 = vmax.f32 %v2537_v56, 0.0  ;;  %v2934_v17 = vadd.f32 %v974_v39, %v686_v11  ;;  %v2936_v61 = vadd.f32 %v975_v42, %v687_v34  ;;  %1242 = vst [vmem:[#allocation17 + $0x20] sm:$0xff] %v985_v40  ;;  %v1577_v42 = vld [vmem:[#allocation11 + $0x8] sm:$0xff]  ;;  %v1582_v14 = vld [vmem:[#allocation11 + $0x30] sm:$0xff] }
 0x12a   :  { %1243 = vst [vmem:[#allocation17 + $0x28] sm:$0xff] %v986_v21  ;;  %v2938_v57 = vadd.f32 %v976_v47, %v688_v37  ;;  %v2940_v26 = vadd.f32 %v977_v54, %v689_v22  ;;  %v2942_v50 = vadd.f32 %v978_v46, %v690_v18  ;;  %1244 = vst [vmem:[#allocation17 + $0x30] sm:$0xff] %v2922_v35  ;;  %v1580_v22 = vld [vmem:[#allocation11 + $0x20] sm:$0xff]  ;;  %v1581_v18 = vld [vmem:[#allocation11 + $0x28] sm:$0xff]  ;;  %1506 = vlog2.f32 %v2354_v49 }
 0x12b   :  { %v2930_v12 = vadd.f32 %v948_v58, %v3444_v23  ;;  %v979_v36 = vmul.f32 %v2913_v8, %v2906_v2  ;;  %1245 = vst [vmem:[#allocation17 + $0x38] sm:$0xff] %v2924_v24  ;;  %1246 = vst [vmem:[#allocation17 + $0x40] sm:$0xff] %v2926_v44  ;;  %v1101_v9 = vmul.f32 %v981_v27, %v981_v27  ;;  %v1579_v27 = vld [vmem:[#allocation11 + $0x18] sm:$0xff]  ;;  %v1584_v23 = vld [vmem:[#allocation11 + $0x40] sm:$0xff]  ;;  %1508 = vlog2.f32 %v2363_v52 }
 0x12c   :  { %v1102_v0 = vmul.f32 %v982_v6, %v982_v6  ;;  %1247 = vst [vmem:[#allocation17 + $0x48] sm:$0xff] %v2934_v17  ;;  %1248 = vst [vmem:[#allocation17 + $0x50] sm:$0xff] %v2936_v61  ;;  %v1103_v54 = vmul.f32 %v983_v3, %v983_v3  ;;  %v1104_v19 = vmul.f32 %v984_v55, %v984_v55 }
 0x12d   :  { %3445 = vst [vmem:[#allocation55_spill] sm:$0xff] %v2930_v12  ;;  %v980_v56 = vmul.f32 %v2930_v12, %v2917_v10  ;;  %v2949_v45 = vadd.f32 %v979_v36, %v691_v59  ;;  %1249 = vst [vmem:[#allocation17 + $0x58] sm:$0xff] %v2938_v57  ;;  %v1117_v39 = vsub.f32 0.0, %v1101_v9  ;;  %v452_v53 = vmul.f32 %v1576_v62, %v1576_v62  ;;  %v1583_v59 = vld [vmem:[#allocation11 + $0x38] sm:$0xff]  ;;  %v1586_v62 = vld [vmem:[#allocation11 + $0x50] sm:$0xff] }
 0x12e   :  { %1250 = vst [vmem:[#allocation17 + $0x60] sm:$0xff] %v2940_v26  ;;  %1251 = vst [vmem:[#allocation17 + $0x68] sm:$0xff] %v2942_v50  ;;  %v1118_v48 = vsub.f32 0.0, %v1102_v0  ;;  %v453_v47 = vmul.f32 %v1577_v42, %v1577_v42  ;;  %v454_v60 = vmul.f32 %v1578_v15, %v1578_v15  ;;  %v2960_v6 = vmul.f32 %v1579_v27, %v1579_v27  ;;  %v1587_v15 = vld [vmem:[#allocation11 + $0x58] sm:$0xff] }
 0x12f   :  { %v2956_v37 = vadd.f32 %v980_v56, %v692_v30  ;;  %1252 = vst [vmem:[#allocation17 + $0x70] sm:$0xff] %v2949_v45  ;;  %v1105_v11 = vmul.f32 %v985_v40, %v985_v40  ;;  %v1119_v34 = vsub.f32 0.0, %v1103_v54  ;;  %v2962_v3 = vmul.f32 %v1580_v22, %v1580_v22  ;;  %v1585_v30 = vld [vmem:[#allocation11 + $0x48] sm:$0xff]  ;;  %v1588_v22 = vld [vmem:[#allocation11 + $0x60] sm:$0xff] }
 0x130   :  { %v2964_v55 = vmul.f32 %v1581_v18, %v1581_v18  ;;  %v2966_v46 = vmul.f32 %v1582_v14, %v1582_v14  ;;  %v2968_v58 = vmul.f32 %v1583_v59, %v1583_v59  ;;  %v2970_v36 = vmul.f32 %v1584_v23, %v1584_v23  ;;  %v1589_v14 = vld [vmem:[#allocation11 + $0x68] sm:$0xff] }
 0x131   :  { %1253 = vst [vmem:[#allocation17 + $0x78] sm:$0xff] %v2956_v37  ;;  %v2972_v56 = vmul.f32 %v1585_v30, %v1585_v30  ;;  %v1106_v40 = vmul.f32 %v986_v21, %v986_v21  ;;  %v1120_v9 = vsub.f32 0.0, %v1104_v19  ;;  %v1133_v0 = vmul.f32 0.5, %v1117_v39 }
 0x132   :  { %v1134_v54 = vmul.f32 0.5, %v1118_v48  ;;  %v2974_v42 = vmul.f32 %v1586_v62, %v1586_v62  ;;  %v2976_v27 = vmul.f32 %v1587_v15, %v1587_v15  ;;  %v2978_v18 = vmul.f32 %v1588_v22, %v1588_v22 }
 0x133   :  { %v2980_v59 = vmul.f32 %v1589_v14, %v1589_v14  ;;  %v1107_v23 = vmul.f32 %v2922_v35, %v2922_v35  ;;  %v1121_v30 = vsub.f32 0.0, %v1105_v11  ;;  %v1135_v21 = vmul.f32 0.5, %v1119_v34 }
 0x134   :  { %v2986_v19 = vmul.f32 %v2452_v29, %v2452_v29  ;;  %v1108_v39 = vmul.f32 %v2924_v24, %v2924_v24  ;;  %v2992_v48 = vmul.f32 %v2457_v33, %v2457_v33  ;;  %v2994_v62 = vmul.f32 -0.5, %v452_v53 }
 0x135   :  { %v2996_v15 = vmul.f32 -0.5, %v453_v47  ;;  %v1109_v35 = vmul.f32 %v2926_v44, %v2926_v44  ;;  %v1122_v11 = vsub.f32 0.0, %v1106_v40  ;;  %v1136_v34 = vmul.f32 0.5, %v1120_v9 }
 0x136   :  { %v1149_v22 = vadd.f32 %v1134_v54, %v1133_v0  ;;  %v1110_v29 = vmul.f32 %v2934_v17, %v2934_v17  ;;  %v1111_v24 = vmul.f32 %v2936_v61, %v2936_v61  ;;  %v1112_v33 = vmul.f32 %v2938_v57, %v2938_v57 }
 0x137   :  { %v3006_v14 = vmul.f32 -0.5, %v454_v60  ;;  %v1113_v53 = vmul.f32 %v2940_v26, %v2940_v26  ;;  %v1123_v47 = vsub.f32 0.0, %v1107_v23  ;;  %v1137_v12 = vmul.f32 0.5, %v1121_v30 }
 0x138   :  { %v1150_v44 = vadd.f32 %v1149_v22, %v1135_v21  ;;  %v1114_v40 = vmul.f32 %v2942_v50, %v2942_v50  ;;  %v1115_v17 = vmul.f32 %v2949_v45, %v2949_v45  ;;  %v1116_v61 = vmul.f32 %v2956_v37, %v2956_v37  ;;  %v3446_v22 = vld [vmem:[#allocation29_spill] sm:$0xff]  ;;  %v3022_v45 = vld [vmem:[%s3276_s7] sm:$0x1] }
 0x139   :  { %v1124_v9 = vsub.f32 0.0, %v1108_v39  ;;  %v1125_v0 = vsub.f32 0.0, %v1109_v35  ;;  %v1138_v57 = vmul.f32 0.5, %v1122_v11  ;;  %v1126_v54 = vsub.f32 0.0, %v1110_v29  ;;  %v3447_v11 = vld [vmem:[#allocation30_spill] sm:$0xff] }
 0x13a   :  { %v1151_v60 = vadd.f32 %v1150_v44, %v1136_v34  ;;  %v1127_v26 = vsub.f32 0.0, %v1111_v24  ;;  %v1128_v23 = vsub.f32 0.0, %v1112_v33  ;;  %v1129_v30 = vsub.f32 0.0, %v1113_v53  ;;  %v3448_v24 = vld [vmem:[#allocation31_spill] sm:$0xff] }
 0x13b   :  { %v1139_v21 = vmul.f32 0.5, %v1123_v47  ;;  %1510 = vlog2.f32 %v3446_v22  ;;  %v1130_v37 = vsub.f32 0.0, %v1114_v40  ;;  %v1131_v39 = vsub.f32 0.0, %v1115_v17  ;;  %v3450_v22 = vld [vmem:[#allocation33_spill] sm:$0xff] }
 0x13c   :  { %v1152_v50 = vadd.f32 %v1151_v60, %v1137_v12  ;;  %v1132_v35 = vsub.f32 0.0, %v1116_v61  ;;  %1512 = vlog2.f32 %v3447_v11  ;;  %v1140_v49 = vmul.f32 0.5, %v1124_v9  ;;  %v3449_v12 = vld [vmem:[#allocation32_spill] sm:$0xff]  ;;  %v3451_v9 = vld [vmem:[#allocation34_spill] sm:$0xff] }
 0x13d   :  { %v1141_v34 = vmul.f32 0.5, %v1125_v0  ;;  %1514 = vlog2.f32 %v3448_v24  ;;  %v1142_v52 = vmul.f32 0.5, %v1126_v54  ;;  %v1143_v33 = vmul.f32 0.5, %v1127_v26  ;;  %v3454_v24 = vld [vmem:[#allocation37_spill] sm:$0xff] }
 0x13e   :  { %v1153_v29 = vadd.f32 %v1152_v50, %v1138_v57  ;;  %1516 = vlog2.f32 %v3449_v12  ;;  %v1177_v53 = vand.u32 2147483647, %v3022_v45  ;;  %v1144_v47 = vmul.f32 0.5, %v1128_v23 }
 0x13f   :  { %v1145_v44 = vmul.f32 0.5, %v1129_v30  ;;  %1518 = vlog2.f32 %v3450_v22  ;;  %v1146_v40 = vmul.f32 0.5, %v1130_v37  ;;  %v3029_v17 = vmul.f32 0.5, %v1131_v39  ;;  %v1507_v37 = vpop.eup %1506 }
 0x140   :  { %v1154_v60 = vadd.f32 %v1153_v29, %v1139_v21  ;;  %v3031_v61 = vmul.f32 0.5, %v1132_v35  ;;  %1520 = vlog2.f32 %v3451_v9  ;;  %v471_v57 = vmul.f32 -0.5, %v2960_v6  ;;  %v3452_v21 = vld [vmem:[#allocation35_spill] sm:$0xff] }
 0x141   :  { %v3036_v54 = vmul.f32 -0.5, %v2962_v3  ;;  %v3039_v26 = vmul.f32 -0.5, %v2964_v55  ;;  %v3042_v23 = vmul.f32 -0.5, %v2966_v46  ;;  %v3045_v30 = vmul.f32 -0.5, %v2968_v58  ;;  %v1509_v55 = vpop.eup %1508 }
 0x142   :  { %v1155_v0 = vadd.f32 %v1154_v60, %v1140_v49  ;;  %1522 = vlog2.f32 %v3452_v21  ;;  %v1178_v50 = vsub.f32 0.0, %v1177_v53  ;;  %v3049_v35 = vmul.f32 -0.5, %v2970_v36  ;;  %v3453_v49 = vld [vmem:[#allocation36_spill] sm:$0xff]  ;;  %v3455_v53 = vld [vmem:[#allocation38_spill] sm:$0xff] }
 0x143   :  { %v3052_v6 = vmul.f32 -0.5, %v2972_v56  ;;  %v3055_v3 = vmul.f32 -0.5, %v2974_v42  ;;  %v3058_v46 = vmul.f32 -0.5, %v2976_v27  ;;  %v3061_v58 = vmul.f32 -0.5, %v2978_v18 }
 0x144   :  { %v1156_v39 = vadd.f32 %v1155_v0, %v1141_v34  ;;  %v485_v11 = vmul.f32 0.6931472, %v1507_v37  ;;  %1524 = vlog2.f32 %v3453_v49  ;;  %v3065_v36 = vmul.f32 -0.5, %v2980_v59  ;;  %v3456_v0 = vld [vmem:[#allocation39_spill] sm:$0xff] }
 0x145   :  { %v1511_v34 = vpop.eup %1510  ;;  %v487_v56 = vmul.f32 0.6931472, %v1509_v55  ;;  %1526 = vlog2.f32 %v3454_v24  ;;  %v1179_v60 = vmul.f32 1.442695, %v1178_v50  ;;  %v3073_v59 = vmul.f32 -0.5, %v2986_v19 }
 0x146   :  { %v1157_v29 = vadd.f32 %v1156_v39, %v1142_v52  ;;  %v1513_v42 = vpop.eup %1512  ;;  %v489_v12 = vmul.f32 0.6931472, %v1511_v34  ;;  %1528 = vlog2.f32 %v3455_v53  ;;  %v516_v27 = vsub.f32 %v2994_v62, %v485_v11  ;;  %v3457_v39 = vld [vmem:[#allocation40_spill] sm:$0xff] }
 0x147   :  { %v1515_v18 = vpop.eup %1514  ;;  %v491_v9 = vmul.f32 0.6931472, %v1513_v42  ;;  %1530 = vlog2.f32 %v3456_v0  ;;  %v517_v52 = vsub.f32 %v2996_v15, %v487_v56  ;;  %v1176_v15 = vmax.f32 %v3022_v45, 0.0 }
 0x148   :  { %v1158_v22 = vadd.f32 %v1157_v29, %v1143_v33  ;;  %v1517_v21 = vpop.eup %1516  ;;  %v493_v37 = vmul.f32 0.6931472, %v1515_v18  ;;  %1532 = vlog2.f32 %v3457_v39  ;;  %v518_v55 = vsub.f32 %v3006_v14, %v489_v12 }
 0x149   :  { %v1519_v49 = vpop.eup %1518  ;;  %v495_v62 = vmul.f32 0.6931472, %v1517_v21  ;;  %v519_v50 = vsub.f32 %v471_v57, %v491_v9  ;;  %v532_v11 = vadd.f32 %v517_v52, %v516_v27  ;;  %v3078_v29 = vmul.f32 -0.5, %v2992_v48 }
 0x14a   :  { %v1159_v34 = vadd.f32 %v1158_v22, %v1144_v47  ;;  %v1521_v33 = vpop.eup %1520  ;;  %1534 = vpow2.f32 %v1179_v60  ;;  %v997_v19 = vmul.f32 %v2776_v1, %v2776_v1  ;;  %v497_v24 = vmul.f32 0.6931472, %v1519_v49  ;;  %v3458_v47 = vld [vmem:[#allocation41_spill] sm:$0xff] }
 0x14b   :  { %v520_v42 = vsub.f32 %v3036_v54, %v493_v37  ;;  %v533_v14 = vadd.f32 %v532_v11, %v518_v55  ;;  %1536 = vlog2.f32 %v3458_v47  ;;  %v998_v57 = vmul.f32 %v2778_v5, %v2778_v5  ;;  %v3459_v54 = vld [vmem:[#allocation42_spill] sm:$0xff] }
 0x14c   :  { %v1160_v56 = vadd.f32 %v1159_v34, %v1145_v44  ;;  %v1523_v12 = vpop.eup %1522  ;;  %v999_v48 = vmul.f32 %v2809_v28, %v2809_v28  ;;  %v1000_v53 = vmul.f32 %v2811_v16, %v2811_v16  ;;  %v499_v60 = vmul.f32 0.6931472, %v1521_v33  ;;  %v3463_v33 = vld [vmem:[#allocation45_spill] sm:$0xff] }
 0x14d   :  { %v521_v1 = vsub.f32 %v3039_v26, %v495_v62  ;;  %v534_v44 = vadd.f32 %v533_v14, %v519_v50  ;;  %1538 = vlog2.f32 %v3459_v54  ;;  %v1001_v22 = vmul.f32 %v2824_v31, %v2824_v31  ;;  %v3462_v62 = vld [vmem:[#allocation44_spill] sm:$0xff] }
 0x14e   :  { %v1161_v27 = vadd.f32 %v1160_v56, %v1146_v40  ;;  %v1525_v18 = vpop.eup %1524  ;;  %v1002_v5 = vmul.f32 %v2826_v41, %v2826_v41  ;;  %v1003_v28 = vmul.f32 %v2828_v43, %v2828_v43  ;;  %v501_v40 = vmul.f32 0.6931472, %v1523_v12 }
 0x14f   :  { %v1527_v9 = vpop.eup %1526  ;;  %v522_v0 = vsub.f32 %v3042_v23, %v497_v24  ;;  %v535_v26 = vadd.f32 %v534_v44, %v520_v42  ;;  %v3103_v21 = vmul.f32 %v2842_v51, %v2842_v51  ;;  %v3107_v31 = vmul.f32 %v2844_v20, %v2844_v20  ;;  %v3460_v20 = vld [vmem:[#allocation53_spill] sm:$0xff] }
 0x150   :  { %v1162_v16 = vadd.f32 %v1161_v27, %v3029_v17  ;;  %v1529_v52 = vpop.eup %1528  ;;  %v3111_v41 = vmul.f32 %v2846_v25, %v2846_v25  ;;  %1540 = vlog2.f32 %v2765_v4  ;;  %v503_v23 = vmul.f32 0.6931472, %v1525_v18  ;;  %v3461_v4 = vld [vmem:[#allocation43_spill] sm:$0xff]  ;;  %v3464_v27 = vld [vmem:[#allocation46_spill] sm:$0xff] }
 0x151   :  { %v1531_v43 = vpop.eup %1530  ;;  %v523_v37 = vsub.f32 %v3045_v30, %v499_v60  ;;  %v536_v39 = vadd.f32 %v535_v26, %v521_v1  ;;  %v3118_v51 = vmul.f32 %v2859_v63, %v2859_v63  ;;  %v3122_v49 = vmul.f32 %v3460_v20, %v3460_v20  ;;  %v3467_v26 = vld [vmem:[#allocation49_spill] sm:$0xff] }
 0x152   :  { %v1163_v17 = vadd.f32 %v1162_v16, %v3031_v61  ;;  %v1533_v55 = vpop.eup %1532  ;;  %v3126_v25 = vmul.f32 %v2873_v7, %v2873_v7  ;;  %1542 = vlog2.f32 %v3461_v4  ;;  %v505_v61 = vmul.f32 0.6931472, %v1527_v9  ;;  %v3470_v4 = vld [vmem:[#allocation52_spill] sm:$0xff] }
 0x153   :  { %v524_v30 = vsub.f32 %v3049_v35, %v501_v40  ;;  %v537_v34 = vadd.f32 %v536_v39, %v522_v0  ;;  %1544 = vlog2.f32 %v3462_v62  ;;  %v3133_v63 = vmul.f32 %v2891_v13, %v2891_v13  ;;  %v3469_v39 = vld [vmem:[#allocation51_spill] sm:$0xff] }
 0x154   :  { %1164 = vadd.xlane.f32.xlu1 %v1163_v17  ;;  %v1535_v50 = vpop.eup %1534  ;;  %v3137_v11 = vmul.f32 %v2906_v2, %v2906_v2  ;;  %v3141_v7 = vmul.f32 %v2917_v10, %v2917_v10  ;;  %1546 = vlog2.f32 %v3463_v33  ;;  %v507_v56 = vmul.f32 0.6931472, %v1529_v52  ;;  %v3468_v17 = vld [vmem:[#allocation50_spill] sm:$0xff] }
 0x155   :  { %v525_v35 = vsub.f32 %v3052_v6, %v503_v23  ;;  %v538_v24 = vadd.f32 %v537_v34, %v523_v37  ;;  %v1181_v42 = vadd.f32 1.0, %v1535_v50  ;;  %v1537_v14 = vpop.eup %1536  ;;  %v1013_v12 = vmul.f32 -0.5, %v997_v19  ;;  %v3465_v6 = vld [vmem:[#allocation47_spill] sm:$0xff]  ;;  %v3471_v34 = vld [vmem:[#allocation54_spill] sm:$0xff] }
 0x156   :  { %v1014_v47 = vmul.f32 -0.5, %v998_v57  ;;  %v3145_v13 = vmul.f32 -0.5, %v999_v48  ;;  %1548 = vlog2.f32 %v3464_v27  ;;  %v509_v2 = vmul.f32 0.6931472, %v1531_v43  ;;  %v3466_v48 = vld [vmem:[#allocation48_spill] sm:$0xff] }
 0x157   :  { %v526_v60 = vsub.f32 %v3055_v3, %v505_v61  ;;  %v539_v1 = vadd.f32 %v538_v24, %v524_v30  ;;  %1550 = vlog2.f32 %v1181_v42  ;;  %v1539_v10 = vpop.eup %1538  ;;  %v511_v44 = vmul.f32 0.6931472, %v1533_v55 }
 0x158   :  { %v1184_v18 = vmul.f32 -0.5, %v1535_v50  ;;  %v3149_v54 = vmul.f32 -0.5, %v1000_v53  ;;  %1552 = vlog2.f32 %v3465_v6  ;;  %v527_v9 = vsub.f32 %v3058_v46, %v507_v56  ;;  %v1174_v6 = vld [vmem:[%s3280_s11] sm:$0x1] }
 0x159   :  { %v540_v19 = vadd.f32 %v539_v1, %v525_v35  ;;  %v3153_v57 = vmul.f32 -0.5, %v1001_v22  ;;  %1554 = vlog2.f32 %v3466_v48  ;;  %v513_v40 = vmul.f32 0.6931472, %v1537_v14 }
 0x15a   :  { %v1541_v16 = vpop.eup %1540  ;;  %v3156_v0 = vmul.f32 -0.5, %v1002_v5  ;;  %v3158_v3 = vmul.f32 -0.5, %v1003_v28  ;;  %1556 = vlog2.f32 %v3467_v26  ;;  %v528_v53 = vsub.f32 %v3061_v58, %v509_v2 }
 0x15b   :  { %v541_v52 = vadd.f32 %v540_v19, %v526_v60  ;;  %v1030_v43 = vmul.f32 0.6931472, %v1541_v16  ;;  %1558 = vlog2.f32 %v3468_v17  ;;  %v515_v23 = vmul.f32 0.6931472, %v1539_v10 }
 0x15c   :  { %v1543_v46 = vpop.eup %1542  ;;  %v529_v22 = vsub.f32 %v3065_v36, %v511_v44  ;;  %v1185_v37 = vadd.f32 1.0, %v1184_v18  ;;  %1560 = vlog2.f32 %v3469_v39  ;;  %v1187_v20 = vand.u32 2147483647, %v1535_v50 }
 0x15d   :  { %v1545_v55 = vpop.eup %1544  ;;  %v542_v5 = vadd.f32 %v541_v52, %v527_v9  ;;  %v1032_v28 = vmul.f32 0.6931472, %v1543_v46  ;;  %1562 = vlog2.f32 %v3470_v4  ;;  %v530_v58 = vsub.f32 %v3073_v59, %v513_v40 }
 0x15e   :  { %v1547_v61 = vpop.eup %1546  ;;  %v1034_v30 = vmul.f32 0.6931472, %v1545_v55  ;;  %1564 = vlog2.f32 %v3471_v34  ;;  %v1061_v62 = vsub.f32 %v1013_v12, %v1030_v43  ;;  %v531_v24 = vsub.f32 %v3078_v29, %v515_v23 }
 0x15f   :  { %v543_v33 = vadd.f32 %v542_v5, %v528_v53  ;;  %v1036_v56 = vmul.f32 0.6931472, %v1547_v61  ;;  %1566 = vlog2.f32 %v2877_v38  ;;  %v1062_v36 = vsub.f32 %v1014_v47, %v1032_v28  ;;  %v3474_v47 = vld [vmem:[#allocation55_spill] sm:$0xff]  ;;  %v1173_v53 = vld [vmem:[%s3275_s6] sm:$0x1]  ;;  %s1844_s6 = smov [#allocation15]  }
 0x160   :  { %v1549_v35 = vpop.eup %1548  ;;  %v1186_v42 = vmul.f32 %v1535_v50, %v1185_v37  ;;  %1568 = vlog2.f32 %v2902_v32  ;;  %v1063_v14 = vsub.f32 %v3145_v13, %v1034_v30  ;;  %vm3172_vm3 = vcmp.lt.f32.partialorder %v1187_v20, 0.0004427343  ;;  %s1285_s11 = sshll.u32 %s1844_s6, 4  ;;  %s1286_s11 = int_to_ptr.vmem [resolvable:$true] %s1285_s11 }
 0x161   :  { %v1551_v27 = vpop.eup %1550  ;;  %v544_v2 = vadd.f32 %v543_v33, %v529_v22  ;;  %v1038_v12 = vmul.f32 0.6931472, %v1549_v35  ;;  %1570 = vlog2.f32 %v2913_v8  ;;  %v1064_v29 = vsub.f32 %v3149_v54, %v1036_v56  ;;  %s1722_s20 = scalar_lea.vmem %s1286_s11, 16  ;;  %s1726_s27 = scalar_lea.vmem %s1286_s11, 32 }
 0x162   :  { %v1553_v60 = vpop.eup %1552  ;;  %v1183_v38 = vmul.f32 0.6931472, %v1551_v27  ;;  %1572 = vlog2.f32 %v3474_v47  ;;  %v1077_v50 = vadd.f32 %v1062_v36, %v1061_v62  ;;  %v1020_v13 = vmul.f32 -0.5, %v3103_v21  ;;  %p1723_p6 = scmp.ne.s32.totalorder %s1286_s11, %s1722_s20  ;;  %p1727_p7 = scmp.lt.s32.totalorder %s1286_s11, %s1286_s11 }
 0x163   :  { %v1555_v1 = vpop.eup %1554  ;;  %v545_v32 = vadd.f32 %v544_v2, %v530_v58  ;;  %v1021_v10 = vmul.f32 -0.5, %v3107_v31  ;;  %v1040_v44 = vmul.f32 0.6931472, %v1553_v60  ;;  %v1065_v19 = vsub.f32 %v3153_v57, %v1038_v12  ;;  %p1728_p8 = scmp.lt.s32.totalorder %s1726_s27, %s1722_s20 }
 0x164   :  { %v1557_v18 = vpop.eup %1556  ;;  %v1189_v8 = vsel %vm3172_vm3, %v1186_v42, %v1183_v38  ;;  %v1042_v9 = vmul.f32 0.6931472, %v1555_v1  ;;  %v1078_v54 = vadd.f32 %v1077_v50, %v1063_v14  ;;  %v1022_v31 = vmul.f32 -0.5, %v3111_v41 }
 0x165   :  { %v1559_v48 = vpop.eup %1558  ;;  %v546_v16 = vadd.f32 %v545_v32, %v531_v24  ;;  %v1190_v21 = vadd.f32 %v1189_v8, %v1176_v15  ;;  %v1023_v40 = vmul.f32 -0.5, %v3118_v51  ;;  %v1024_v52 = vmul.f32 -0.5, %v3122_v49  ;;  %p1729_p9 = por %p1728_p8, %p1727_p7 }
 0x166   :  { %v1561_v26 = vpop.eup %1560  ;;  %v1044_v43 = vmul.f32 0.6931472, %v1557_v18  ;;  %v1066_v57 = vsub.f32 %v3156_v0, %v1040_v44  ;;  %v1079_v17 = vadd.f32 %v1078_v54, %v1064_v29  ;;  %v1025_v45 = vmul.f32 -0.5, %v3126_v25 }
 0x167   :  { %v1563_v46 = vpop.eup %1562  ;;  %547 = vadd.xlane.f32.xlu0 %v546_v16  ;;  %v1191_v23 = vmul.f32 %v1190_v21, %v1174_v6  ;;  %v1026_v15 = vmul.f32 -0.5, %v3133_v63  ;;  %v1027_v41 = vmul.f32 -0.5, %v3137_v11  ;;  %v1046_v22 = vmul.f32 0.6931472, %v1559_v48  ;;  %p1730_p10 = pnand %p1729_p9, %p1723_p6 }
 0x168   :  { %v1565_v51 = vpop.eup %1564  ;;  %v1050_v37 = vmul.f32 0.6931472, %v1563_v46  ;;  %v1067_v39 = vsub.f32 %v3158_v3, %v1042_v9  ;;  %v1080_v55 = vadd.f32 %v1079_v17, %v1065_v19  ;;  %v1028_v0 = vmul.f32 -0.5, %v3141_v7 }
 0x169   :  { %v1567_v49 = vpop.eup %1566  ;;  %v1192_v5 = vadd.f32 %v1191_v23, %v1173_v53  ;;  %v1048_v20 = vmul.f32 0.6931472, %v1561_v26  ;;  %v1052_v28 = vmul.f32 0.6931472, %v1565_v51  ;;  %v1068_v58 = vsub.f32 %v1020_v13, %v1044_v43 }
 0x16a   :  { %v1569_v4 = vpop.eup %1568  ;;  %v1054_v61 = vmul.f32 0.6931472, %v1567_v49  ;;  %v1071_v25 = vsub.f32 %v1023_v40, %v1050_v37  ;;  %v1081_v30 = vadd.f32 %v1080_v55, %v1066_v57  ;;  %1574 = vlog2.f32 %v1190_v21 }
 0x16b   :  { %v1571_v63 = vpop.eup %1570  ;;  %v1208_v34 = vmul.f32 %v1192_v5, %v1192_v5  ;;  %1254 = vst [vmem:[#allocation18] sm:$0x1] %v1192_v5  ;;  %v1056_v11 = vmul.f32 0.6931472, %v1569_v4  ;;  %v1072_v62 = vsub.f32 %v1024_v52, %v1052_v28  ;;  %v1069_v56 = vsub.f32 %v1021_v10, %v1046_v22 }
 0x16c   :  { %v1573_v33 = vpop.eup %1572  ;;  %v1058_v3 = vmul.f32 0.6931472, %v1571_v63  ;;  %v1073_v36 = vsub.f32 %v1025_v45, %v1054_v61  ;;  %v1082_v35 = vadd.f32 %v1081_v30, %v1067_v39  ;;  %v1070_v14 = vsub.f32 %v1022_v31, %v1048_v20 }
 0x16d   :  { %v1209_v24 = vsub.f32 0.0, %v1208_v34  ;;  %v1060_v7 = vmul.f32 0.6931472, %v1573_v33  ;;  %v1074_v42 = vsub.f32 %v1026_v15, %v1056_v11  ;;  %v1193_v1 = vmul.f32 %v1174_v6, %v1174_v6 }
 0x16e   :  { %v1075_v27 = vsub.f32 %v1027_v41, %v1058_v3  ;;  %v1083_v2 = vadd.f32 %v1082_v35, %v1068_v58 }
 0x16f   :  { %v1210_v59 = vmul.f32 0.5, %v1209_v24  ;;  %v1076_v12 = vsub.f32 %v1028_v0, %v1060_v7  ;;  %v1194_v10 = vmul.f32 -0.5, %v1193_v1 }
 0x170   :  { %v1084_v60 = vadd.f32 %v1083_v2, %v1069_v56 }
 0x171   :  { %v1211_v38 = vsel %vm653_vm1, %v1210_v59, 0.0 }
 0x172   :  { %1212 = vadd.xlane.f32.xlu1 %v1211_v38  ;;  %v1085_v47 = vadd.f32 %v1084_v60, %v1070_v14 }
 0x174   :  { %v1086_v29 = vadd.f32 %v1085_v47, %v1071_v25  ;;  %v1575_v50 = vpop.eup %1574 }
 0x175   :  { %v1196_v44 = vmul.f32 0.6931472, %v1575_v50 }
 0x176   :  { %v1087_v32 = vadd.f32 %v1086_v29, %v1072_v62 }
 0x177   :  { %v1197_v9 = vsub.f32 %v1194_v10, %v1196_v44 }
 0x178   :  { %v1088_v13 = vadd.f32 %v1087_v32, %v1073_v36 }
 0x179   :  { %v1198_v54 = vsel %vm653_vm1, %v1197_v9, 0.0 }
 0x17a   :  { %v1089_v18 = vadd.f32 %v1088_v13, %v1074_v42 }
 0x17c   :  { %v1090_v8 = vadd.f32 %v1089_v18, %v1075_v27 }
 0x17e   :  { %v1091_v19 = vadd.f32 %v1090_v8, %v1076_v12 }
 0x180   :  { %1092 = vadd.xlane.f32.xlu0 %v1091_v19 }
 0x184   :  { %1199 = vadd.xlane.f32.xlu0 %v1198_v54 }
 0x185   :  { %1733 = shalt.err (!%p1730_p10)
}
 0x186   :  { %s1734_s1 = scalar_lea.hbm %s3282_s13, 16 }
 0x187   :  { %p1735_p11 = scmp.ne.s32.totalorder %s3282_s13, %s1734_s1  ;;  %p1738_p12 = scmp.lt.u32.totalorder %s1734_s1, %s3282_s13 }
 0x189   :  { %p1740_p13 = pnand %p1738_p12, %p1735_p11 }
 0x18b   :  { %1743 = shalt.err (!%p1740_p13)
}
 0x18c   :  { %1288 = dma.vmem_to_hbm [thread:$0]  %s1286_s11, 16, %s3282_s13, [#allocation16]  }
 0x18d   :  { %s1744_s25 = scalar_lea.vmem %s1273_s29, 2048  ;;  %p1749_p1 = scmp.lt.s32.totalorder %s1273_s29, %s1273_s29 }
 0x18e   :  { %p1745_p0 = scmp.ne.s32.totalorder %s1273_s29, %s1744_s25  ;;  %p1750_p2 = scmp.lt.s32.totalorder %s1744_s25, %s1744_s25 }
 0x190   :  { %p1751_p3 = por %p1750_p2, %p1749_p1 }
 0x192   :  { %p1752_p4 = pnand %p1751_p3, %p1745_p0 }
 0x194   :  { %1755 = shalt.err (!%p1752_p4)
}
 0x195   :  { %s1756_s9 = scalar_lea.hbm %s3281_s12, 2048 }
 0x196   :  { %p1757_p5 = scmp.ne.s32.totalorder %s3281_s12, %s1756_s9  ;;  %p1760_p6 = scmp.lt.u32.totalorder %s1756_s9, %s3281_s12 }
 0x198   :  { %p1762_p7 = pnand %p1760_p6, %p1757_p5 }
 0x19a   :  { %1765 = shalt.err (!%p1762_p7)
}
 0x19b   :  { %1278 = dma.vmem_to_hbm [thread:$0]  %s1273_s29, 2048, %s3281_s12, [#allocation4], %s1838_s18, %s1838_s18, %s1839_s19  }
 0x19c   :  { %s1846_s23 = smov [#allocation17]   ;;  %s1847_s11 = smov [#allocation18]  }
 0x19d   :  { %s1294_s6 = sshll.u32 %s1846_s23, 4  ;;  %s1307_s28 = sshll.u32 %s1847_s11, 4  ;;  %s1295_s6 = int_to_ptr.vmem [resolvable:$true] %s1294_s6  ;;  %s1308_s28 = int_to_ptr.vmem [resolvable:$true] %s1307_s28 }
 0x19e   :  { %s1766_s20 = scalar_lea.vmem %s1295_s6, 2048  ;;  %p1771_p9 = scmp.lt.s32.totalorder %s1295_s6, %s1295_s6 }
 0x19f   :  { %p1767_p8 = scmp.ne.s32.totalorder %s1295_s6, %s1766_s20  ;;  %p1772_p10 = scmp.lt.s32.totalorder %s1766_s20, %s1766_s20 }
 0x1a1   :  { %p1773_p11 = por %p1772_p10, %p1771_p9 }
 0x1a3   :  { %p1774_p12 = pnand %p1773_p11, %p1767_p8 }
 0x1a5   :  { %1777 = shalt.err (!%p1774_p12)
}
 0x1a6   :  { %s1778_s5 = scalar_lea.hbm %s3283_s14, 2048 }
 0x1a7   :  { %p1779_p13 = scmp.ne.s32.totalorder %s3283_s14, %s1778_s5  ;;  %p1782_p0 = scmp.lt.u32.totalorder %s1778_s5, %s3283_s14 }
 0x1a9   :  { %p1784_p1 = pnand %p1782_p0, %p1779_p13 }
 0x1ab   :  { %1787 = shalt.err (!%p1784_p1)
}
 0x1ac   :  { %1300 = dma.vmem_to_hbm [thread:$0]  %s1295_s6, 2048, %s3283_s14, [#allocation16], %s1838_s18, %s1838_s18, %s1839_s19  }
 0x1ad   :  { %s1788_s0 = scalar_lea.vmem %s1308_s28, 16  ;;  %s1792_s16 = scalar_lea.vmem %s1308_s28, 32 }
 0x1ae   :  { %p1789_p2 = scmp.ne.s32.totalorder %s1308_s28, %s1788_s0  ;;  %p1793_p3 = scmp.lt.s32.totalorder %s1308_s28, %s1308_s28 }
 0x1af   :  { %p1794_p4 = scmp.lt.s32.totalorder %s1792_s16, %s1788_s0 }
 0x1b1   :  { %p1795_p5 = por %p1794_p4, %p1793_p3 }
 0x1b3   :  { %p1796_p6 = pnand %p1795_p5, %p1789_p2 }
 0x1b5   :  { %1799 = shalt.err (!%p1796_p6)
}
 0x1b6   :  { %s1800_s10 = scalar_lea.hbm %s3284_s15, 16 }
 0x1b7   :  { %p1801_p7 = scmp.ne.s32.totalorder %s3284_s15, %s1800_s10  ;;  %p1804_p8 = scmp.lt.u32.totalorder %s1800_s10, %s3284_s15 }
 0x1b9   :  { %p1806_p9 = pnand %p1804_p8, %p1801_p7 }
 0x1bb   :  { %1809 = shalt.err (!%p1806_p9)
}
 0x1bc   :  { %1310 = dma.vmem_to_hbm [thread:$0]  %s1308_s28, 16, %s3284_s15, [#allocation19]   ;;  %v669_v6 = vpop.xlane.xlu1 %668  ;;  %v620_v48 = vpop.xlane.xlu0 %619 }
 0x1bd   :  { %v621_v21 = vrot.slane %v620_v48, 4  ;;  %v670_v40 = vrot.slane %v669_v6, 4  ;;  %s3475_s17 = sld [smem:[#allocation57_spill]] }
 0x1bf   :  { %v622_v26 = vadd.f32 %v621_v21, %v620_v48  ;;  %v671_v52 = vadd.f32 %v670_v40, %v669_v6 }
 0x1c0   :  { %v656_v16 = vpop.xlane.xlu1 %655 }
 0x1c1   :  { %v657_v31 = vrot.slane %v656_v16, 4  ;;  %v623_v43 = vrot.slane %v622_v26, 2  ;;  %v672_v23 = vrot.slane %v671_v52, 2 }
 0x1c3   :  { %v658_v53 = vadd.f32 %v657_v31, %v656_v16  ;;  %v624_v15 = vadd.f32 %v623_v43, %v622_v26  ;;  %v673_v22 = vadd.f32 %v672_v23, %v671_v52  ;;  %s1810_s8 = scalar_lea.hbm %s3475_s17, 16 }
 0x1c4   :  { %p1811_p10 = scmp.ne.s32.totalorder %s3475_s17, %s1810_s8  ;;  %p1814_p11 = scmp.lt.u32.totalorder %s1810_s8, %s3475_s17 }
 0x1c5   :  { %v659_v17 = vrot.slane %v658_v53, 2  ;;  %v625_v39 = vrot.slane %v624_v15, 1  ;;  %v674_v5 = vrot.slane %v673_v22, 1 }
 0x1c6   :  { %p1816_p12 = pnand %p1814_p11, %p1811_p10 }
 0x1c7   :  { %v660_v51 = vadd.f32 %v659_v17, %v658_v53  ;;  %v626_v28 = vadd.f32 %v625_v39, %v624_v15  ;;  %v675_v61 = vadd.f32 %v674_v5, %v673_v22 }
 0x1c9   :  { %v661_v49 = vrot.slane %v660_v51, 1 }
 0x1cb   :  { %v662_v4 = vadd.f32 %v661_v49, %v660_v51 }
 0x1e1   :  { %v1165_v20 = vpop.xlane.xlu1 %1164 }
 0x1e2   :  { %v1166_v58 = vrot.slane %v1165_v20, 4 }
 0x1e4   :  { %v1167_v30 = vadd.f32 %v1166_v58, %v1165_v20 }
 0x1e6   :  { %v1168_v34 = vrot.slane %v1167_v30, 2 }
 0x1e8   :  { %v1169_v35 = vadd.f32 %v1168_v34, %v1167_v30 }
 0x1ea   :  { %v1170_v2 = vrot.slane %v1169_v35, 1 }
 0x1ec   :  { %v1171_v47 = vadd.f32 %v1170_v2, %v1169_v35 }
 0x1f4   :  { %v548_v57 = vpop.xlane.xlu0 %547 }
 0x1f5   :  { %v549_v46 = vrot.slane %v548_v57, 4 }
 0x1f7   :  { %v550_v45 = vadd.f32 %v549_v46, %v548_v57 }
 0x1f9   :  { %v551_v41 = vrot.slane %v550_v45, 2 }
 0x1fb   :  { %v552_v37 = vadd.f32 %v551_v41, %v550_v45 }
 0x1fd   :  { %v553_v55 = vrot.slane %v552_v37, 1 }
 0x1ff   :  { %v554_v0 = vadd.f32 %v553_v55, %v552_v37  ;;  %v1213_v25 = vpop.xlane.xlu1 %1212 }
 0x200   :  { %v1214_v63 = vrot.slane %v1213_v25, 4 }
 0x201   :  { %1343 = vpush %v554_v0 }
 0x202   :  { %1345 = vpush %v626_v28  ;;  %v1215_v11 = vadd.f32 %v1214_v63, %v1213_v25 }
 0x203   :  { %1347 = vpush %v662_v4 }
 0x204   :  { %1349 = vpush %v675_v61  ;;  %v1216_v56 = vrot.slane %v1215_v11, 2 }
 0x206   :  { %v1217_v27 = vadd.f32 %v1216_v56, %v1215_v11 }
 0x208   :  { %v1218_v29 = vrot.slane %v1217_v27, 1 }
 0x20a   :  { %v1219_v32 = vadd.f32 %v1218_v29, %v1217_v27 }
 0x20d   :  { %v1093_v62 = vpop.xlane.xlu0 %1092 }
 0x20e   :  { %v1094_v33 = vrot.slane %v1093_v62, 4 }
 0x210   :  { %v1095_v3 = vadd.f32 %v1094_v33, %v1093_v62 }
 0x211   :  { %v1200_v36 = vpop.xlane.xlu0 %1199 }
 0x212   :  { %v1096_v24 = vrot.slane %v1095_v3, 2  ;;  %v1201_v7 = vrot.slane %v1200_v36, 4 }
 0x214   :  { %v1202_v42 = vadd.f32 %v1201_v7, %v1200_v36  ;;  %v1097_v14 = vadd.f32 %v1096_v24, %v1095_v3 }
 0x216   :  { %v1203_v59 = vrot.slane %v1202_v42, 2  ;;  %v1098_v12 = vrot.slane %v1097_v14, 1 }
 0x218   :  { %v1204_v60 = vadd.f32 %v1203_v59, %v1202_v42  ;;  %v1099_v38 = vadd.f32 %v1098_v12, %v1097_v14 }
 0x21a   :  { %1351 = vpush %v1099_v38  ;;  %v1205_v50 = vrot.slane %v1204_v60, 1 }
 0x21b   :  { %1353 = vpush %v1171_v47 }
 0x21c   :  { %v1206_v1 = vadd.f32 %v1205_v50, %v1204_v60 }
 0x21e   :  { %1355 = vpush %v1206_v1 }
 0x21f   :  { %1357 = vpush %v1219_v32 }
 0x232   :  { %s1344_s15 = spop %1343 }
 0x233   :  { %s1346_s19 = spop %1345 }
 0x234   :  { %s1348_s7 = spop %1347 }
 0x235   :  { %s1350_s26 = spop %1349  ;;  %s1255_s4 = sadd.f32 %s1348_s7, %s1344_s15 }
 0x236   :  { %s1261_s6 = sadd.f32 %s1350_s26, %s1346_s19 }
 0x24b   :  { %s1352_s13 = spop %1351 }
 0x24c   :  { %s1354_s23 = spop %1353  ;;  %s1256_s11 = sadd.f32 %s1352_s13, %s1255_s4 }
 0x24d   :  { %s1262_s28 = sadd.f32 %s1354_s23, %s1261_s6 }
 0x24f   :  { %s1356_s20 = spop %1355 }
 0x250   :  { %s1257_s27 = sadd.f32 %s1356_s20, %s1256_s11  ;;  %s1358_s30 = spop %1357 }
 0x251   :  { %s1263_s5 = sadd.f32 %s1358_s30, %s1262_s28 }
 0x252   :  { %s1258_s1 = sadd.f32 -742.5023, %s1257_s27 }
 0x253   :  { %s1264_s22 = sadd.f32 -742.5023, %s1263_s5 }
 0x254   :  { %1260 = sst [smem:[#allocation20]] %s1258_s1 }
 0x255   :  { %1266 = sst [smem:[#allocation20 + $0x1]] %s1264_s22 }
 0x256   :  { %1819 = shalt.err (!%p1816_p12)
}
 0x257   :  { %s1848_s10 = smov [#allocation20]  }
 0x258   :  { %1318 = dma.smem_to_hbm %s1848_s10, 16, %s3475_s17, [#allocation5]  }
 0x259   :  { %1828 = dma.done.wait [#allocation4], 2048  }
 0x25a   :  { %1829 = vsyncadd [#allocation4], 4294965248 }
 0x25b   :  { %1830 = dma.done.wait [#allocation16], 2064  }
 0x25c   :  { %1831 = vsyncadd [#allocation16], 4294965232 }
 0x25d   :  { %1832 = dma.done.wait [#allocation19], 16  }
 0x25e   :  { %1833 = vsyncadd [#allocation19], 4294967280 }
 0x25f   :  { %1834 = dma.done.wait [#allocation5], 16  }
 0x260   :  { %1835 = vsyncadd [#allocation5], 4294967280 }
 0x261   :  { %1334 = sfence }
 0x262   :  { %1335 = vsyncpa [#allocation3], 1 }
 0x263   :  { %1336 = vsyncpa [#allocation7], 1 }
 0x264   :  { %1337 = vsyncpa [#allocation10], 1 }
 0x265   :  { %1338 = vsyncpa [#allocation13], 1 }
 0x266   :  { %1339 = vsyncpa [#allocation4], 1 }
 0x267   :  { %1340 = vsyncpa [#allocation16], 1 }
 0x268   :  { %1341 = vsyncpa [#allocation19], 1 }
 0x269   :  { %1342 = vsyncpa [#allocation5], 1 }

</bundles_post_ra>
